<compile_context>
chip_gen: v7x
topology: tpu7x:2x2x1
jax: 0.10.0
libtpu: 0.0.40
codegen_flags: <defaults>
</compile_context>

<pallas_src>
import jax
import jax.numpy as jnp
from jax import lax
from jax.experimental import pallas as pl
from jax.experimental.pallas import tpu as pltpu


RC_ROWS = 32  # slab rows per inner chunk  (= 512 batch rows per chunk)


def init_params(key):
    """PyTorch-style Linear init (U[-1/sqrt(fan_in), +1/sqrt(fan_in)]),
    weights stored in PyTorch (out_features, in_features) layout."""
    ks = jax.random.split(key, 6)

    def linear(kw, kb, fan_in, fan_out):
        bound = 1.0 / jnp.sqrt(jnp.float32(fan_in))
        w = jax.random.uniform(kw, (fan_out, fan_in), jnp.float32, -bound, bound)
        b = jax.random.uniform(kb, (fan_out,), jnp.float32, -bound, bound)
        return w, b

    w1, b1 = linear(ks[0], ks[1], 8, 32)     # (32, 8),  (32,)
    w2, b2 = linear(ks[2], ks[3], 32, 16)    # (16, 32), (16,)
    w3, b3 = linear(ks[4], ks[5], 16, 1)     # (1, 16),  (1,)
    return {"w1": w1, "b1": b1, "w2": w2, "b2": b2, "w3": w3, "b3": b3}


def critic_reference(x, p):
    """Pure-JAX reference of the PyTorch forward (also the small-B path)."""
    h = jnp.maximum(x @ p["w1"].T + p["b1"], 0.0)
    h = jnp.maximum(h @ p["w2"].T + p["b2"], 0.0)
    return h @ p["w3"].T + p["b3"]


def critic_kernel(x_ref, w1_ref, b1_ref, w2_ref, b2_ref, w3_ref, b3_ref, o_ref):
    # x_ref: (R, 128) slab block (R slab rows = 16*R batch rows, lane-dense).
    # Weights are the block-diagonal "kron" forms; o_ref: (R, 16).
    nchunks = x_ref.shape[0] // RC_ROWS  # static

    def chunk(c, carry):
        r0 = pl.multiple_of(c * RC_ROWS, RC_ROWS)
        xs = x_ref[pl.ds(r0, RC_ROWS), :]                                # (32, 128)

        # Layer 1: (32,128) @ (128,512) -> (32,512); col 32*s+o = h1[b, o]
        h1 = jnp.dot(xs, w1_ref[...], preferred_element_type=jnp.float32)
        h1 = jnp.maximum(h1 + b1_ref[...], 0.0)

        # Layer 2: (32,512) @ (512,256) -> (32,256); col 16*s+o = h2[b, o]
        h2 = jnp.dot(h1, w2_ref[...], preferred_element_type=jnp.float32)
        h2 = jnp.maximum(h2 + b2_ref[...], 0.0)

        # Layer 3: (32,256) @ (256,16) -> (32,16); col s = out[16*r+s]
        o = jnp.dot(h2, w3_ref[...], preferred_element_type=jnp.float32)
        o = o + b3_ref[...]

        o_ref[pl.ds(r0, RC_ROWS), :] = o.astype(o_ref.dtype)
        return carry

    lax.fori_loop(0, nchunks, chunk, None, unroll=True)


def _round_up(n, m):
    return -(-n // m) * m


def critic_forward(x, params, *, tb=4096, min_pallas_batch=1024):
    """x: (B, 8) float32.  Returns (B, 1) float32."""
    B, F = x.shape
    assert F == 8, "Critic expects 8 input features"

    if B < min_pallas_batch:
        # Small-batch dispatch: pallas_call launch / DMA prologue dominates.
        return critic_reference(x, params)

    assert tb % (16 * RC_ROWS) == 0, "tb must be a multiple of 512"

    w1, b1 = params["w1"], params["b1"]   # (32, 8),  (32,)
    w2, b2 = params["w2"], params["b2"]   # (16, 32), (16,)
    w3, b3 = params["w3"], params["b3"]   # (1, 16),  (1,)

    # Block-diagonal weights so the kernel consumes the interleaved slab
    # layout with plain matmuls (built per call; trivial cost, jit-fusable).
    eye16 = jnp.eye(16, dtype=jnp.float32)
    w1_big = jnp.kron(eye16, w1.T)        # (128, 512)
    w2_big = jnp.kron(eye16, w2.T)        # (512, 256)
    w3_big = jnp.kron(eye16, w3.T)        # (256, 16)
    b1_big = jnp.tile(b1, 16)[None, :]    # (1, 512)
    b2_big = jnp.tile(b2, 16)[None, :]    # (1, 256)
    b3_big = b3.reshape(1, 1)             # (1, 1)

    # Slab geometry: each slab row holds 16 batch rows x 8 features = 128 lanes.
    rows = -(-B // 16)
    r_block = min(tb // 16, _round_up(rows, RC_ROWS))   # slab rows per grid step
    rows_pad = _round_up(rows, r_block)                 # whole number of blocks
    b_pad = rows_pad * 16
    xp = jnp.pad(x, ((0, b_pad - B), (0, 0))) if b_pad != B else x
    slab = xp.reshape(rows_pad, 128)                    # bit-identical reshape
    grid = (rows_pad // r_block,)

    # Weights/biases: constant block index -> DMA'd once, resident in VMEM.
    def resident(a):
        return pl.BlockSpec(a.shape, lambda i: (0,) * a.ndim)

    out_slab = pl.pallas_call(
        critic_kernel,
        out_shape=jax.ShapeDtypeStruct((rows_pad, 16), jnp.float32),
        grid=grid,
        in_specs=[
            pl.BlockSpec((r_block, 128), lambda i: (i, 0)),   # batch-tiled slab
            resident(w1_big), resident(b1_big),
            resident(w2_big), resident(b2_big),
            resident(w3_big), resident(b3_big),
        ],
        out_specs=pl.BlockSpec((r_block, 16), lambda i: (i, 0)),
        compiler_params=pltpu.CompilerParams(
            # TODO(synk): on v7x, verify with a trace that both TensorCores are
            # busy; if not, switch this axis to pltpu.CORE_PARALLEL.
            dimension_semantics=("parallel",),
        ),
    )(slab, w1_big, b1_big, w2_big, b2_big, w3_big, b3_big)

    out = out_slab.reshape(b_pad, 1)
    return out[:B] if b_pad != B else out


if __name__ == "__main__":
    key = jax.random.PRNGKey(0)
    kp, kx = jax.random.split(key)
    params = init_params(kp)

    # 1) Small batch (module-scale shape): goes down the fused-XLA dispatch path.
    x_small = jax.random.normal(jax.random.fold_in(kx, 0), (8, 8), jnp.float32)
    out_small = jax.block_until_ready(critic_forward(x_small, params))
    ref_small = critic_reference(x_small, params)
    assert out_small.shape == (8, 1)
    assert jnp.allclose(out_small, ref_small, atol=1e-5, rtol=1e-5)

    # 2) Force the Pallas path with a ragged batch: exercises padding, a
    #    multi-step grid (3 blocks at tb=1024) and the inner chunk loop.
    B1 = 3000
    x1 = jax.random.normal(jax.random.fold_in(kx, 1), (B1, 8), jnp.float32)
    out1 = jax.block_until_ready(
        critic_forward(x1, params, tb=1024, min_pallas_batch=0))
    ref1 = critic_reference(x1, params)
    assert out1.shape == (B1, 1)
    assert jnp.allclose(out1, ref1, atol=1e-4, rtol=1e-4)

    # 3) Default tile (tb=4096): ragged multi-block grid through the big tile.
    B2 = 8192 + 160
    x2 = jax.random.normal(jax.random.fold_in(kx, 2), (B2, 8), jnp.float32)
    out2 = jax.block_until_ready(critic_forward(x2, params))
    ref2 = critic_reference(x2, params)
    assert out2.shape == (B2, 1)
    assert jnp.allclose(out2, ref2, atol=1e-4, rtol=1e-4)

    print("KERNEL_OK")
</pallas_src>

<mosaic_0001>
module attributes {stable_mosaic.version = 11 : i64} {
  func.func @critic_kernel(%arg0: i32, %arg1: memref<64x128xf32, #tpu.memory_space<vmem>>, %arg2: memref<128x512xf32, #tpu.memory_space<vmem>>, %arg3: memref<1x512xf32, #tpu.memory_space<vmem>>, %arg4: memref<512x256xf32, #tpu.memory_space<vmem>>, %arg5: memref<1x256xf32, #tpu.memory_space<vmem>>, %arg6: memref<256x16xf32, #tpu.memory_space<vmem>>, %arg7: memref<1x1xf32, #tpu.memory_space<vmem>>, %arg8: memref<64x16xf32, #tpu.memory_space<vmem>>) attributes {dimension_semantics = [#tpu.dimension_semantics<parallel>], iteration_bounds = array<i64: 3>, scalar_prefetch = 0 : i64, scratch_operands = 0 : i64, tpu.core_type = #tpu.core_type<tc>, window_params = [{transform_indices = @transform_0, window_bounds = array<i64: 64, 128>}, {pipeline_mode = #tpu.pipeline_mode<synchronous>, transform_indices = @transform_1, window_bounds = array<i64: 128, 512>}, {pipeline_mode = #tpu.pipeline_mode<synchronous>, transform_indices = @transform_2, window_bounds = array<i64: 1, 512>}, {pipeline_mode = #tpu.pipeline_mode<synchronous>, transform_indices = @transform_3, window_bounds = array<i64: 512, 256>}, {pipeline_mode = #tpu.pipeline_mode<synchronous>, transform_indices = @transform_4, window_bounds = array<i64: 1, 256>}, {pipeline_mode = #tpu.pipeline_mode<synchronous>, transform_indices = @transform_5, window_bounds = array<i64: 256, 16>}, {pipeline_mode = #tpu.pipeline_mode<synchronous>, transform_indices = @transform_6, window_bounds = array<i64: 1, 1>}, {transform_indices = @transform_7, window_bounds = array<i64: 64, 16>}]} {
    %c0_i32 = arith.constant 0 : i32
    %c32_i32 = arith.constant 32 : i32
    %0 = arith.muli %c0_i32, %c32_i32 : i32
    %1 = tpu.assume_multiple %0, 32 : i32
    %2 = arith.index_cast %1 : i32 to index
    %c0 = arith.constant 0 : index
    %3 = vector.load %arg1[%2, %c0] : memref<64x128xf32, #tpu.memory_space<vmem>>, vector<32x128xf32>
    %c0_0 = arith.constant 0 : index
    %c0_1 = arith.constant 0 : index
    %4 = vector.load %arg2[%c0_0, %c0_1] : memref<128x512xf32, #tpu.memory_space<vmem>>, vector<128x512xf32>
    %cst = arith.constant dense<0.000000e+00> : vector<32x512xf32>
    %5 = tpu.matmul %3, %4, %cst {dimension_numbers = #tpu.dot_dimension_numbers<[1], [0], [0], [1], [0, 0, 1, 1], [], []>} : vector<32x128xf32>, vector<128x512xf32>, vector<32x512xf32> -> vector<32x512xf32>
    %c0_2 = arith.constant 0 : index
    %c0_3 = arith.constant 0 : index
    %6 = vector.load %arg3[%c0_2, %c0_3] : memref<1x512xf32, #tpu.memory_space<vmem>>, vector<1x512xf32>
    %7 = vector.broadcast %6 : vector<1x512xf32> to vector<32x512xf32>
    %8 = arith.addf %5, %7 : vector<32x512xf32>
    %cst_4 = arith.constant 0.000000e+00 : f32
    %9 = vector.broadcast %cst_4 : f32 to vector<32x512xf32>
    %10 = arith.maximumf %8, %9 : vector<32x512xf32>
    %c0_5 = arith.constant 0 : index
    %c0_6 = arith.constant 0 : index
    %11 = vector.load %arg4[%c0_5, %c0_6] : memref<512x256xf32, #tpu.memory_space<vmem>>, vector<512x256xf32>
    %cst_7 = arith.constant dense<0.000000e+00> : vector<32x256xf32>
    %12 = tpu.matmul %10, %11, %cst_7 {dimension_numbers = #tpu.dot_dimension_numbers<[1], [0], [0], [1], [0, 0, 1, 1], [], []>} : vector<32x512xf32>, vector<512x256xf32>, vector<32x256xf32> -> vector<32x256xf32>
    %c0_8 = arith.constant 0 : index
    %c0_9 = arith.constant 0 : index
    %13 = vector.load %arg5[%c0_8, %c0_9] : memref<1x256xf32, #tpu.memory_space<vmem>>, vector<1x256xf32>
    %14 = vector.broadcast %13 : vector<1x256xf32> to vector<32x256xf32>
    %15 = arith.addf %12, %14 : vector<32x256xf32>
    %cst_10 = arith.constant 0.000000e+00 : f32
    %16 = vector.broadcast %cst_10 : f32 to vector<32x256xf32>
    %17 = arith.maximumf %15, %16 : vector<32x256xf32>
    %c0_11 = arith.constant 0 : index
    %c0_12 = arith.constant 0 : index
    %18 = vector.load %arg6[%c0_11, %c0_12] : memref<256x16xf32, #tpu.memory_space<vmem>>, vector<256x16xf32>
    %cst_13 = arith.constant dense<0.000000e+00> : vector<32x16xf32>
    %19 = tpu.matmul %17, %18, %cst_13 {dimension_numbers = #tpu.dot_dimension_numbers<[1], [0], [0], [1], [0, 0, 1, 1], [], []>} : vector<32x256xf32>, vector<256x16xf32>, vector<32x16xf32> -> vector<32x16xf32>
    %c0_14 = arith.constant 0 : index
    %c0_15 = arith.constant 0 : index
    %20 = vector.load %arg7[%c0_14, %c0_15] : memref<1x1xf32, #tpu.memory_space<vmem>>, vector<1x1xf32>
    %21 = vector.broadcast %20 : vector<1x1xf32> to vector<32x16xf32>
    %22 = arith.addf %19, %21 : vector<32x16xf32>
    %23 = arith.index_cast %1 : i32 to index
    %c0_16 = arith.constant 0 : index
    %24 = vector.load %arg8[%23, %c0_16] : memref<64x16xf32, #tpu.memory_space<vmem>>, vector<32x16xf32>
    tpu.vector_store %arg8[%23, %c0_16], %22 {strides = array<i32>} : memref<64x16xf32, #tpu.memory_space<vmem>>, vector<32x16xf32>,
    %c1_i32 = arith.constant 1 : i32
    %c32_i32_17 = arith.constant 32 : i32
    %25 = arith.muli %c1_i32, %c32_i32_17 : i32
    %26 = tpu.assume_multiple %25, 32 : i32
    %27 = arith.index_cast %26 : i32 to index
    %c0_18 = arith.constant 0 : index
    %28 = vector.load %arg1[%27, %c0_18] : memref<64x128xf32, #tpu.memory_space<vmem>>, vector<32x128xf32>
    %c0_19 = arith.constant 0 : index
    %c0_20 = arith.constant 0 : index
    %29 = vector.load %arg2[%c0_19, %c0_20] : memref<128x512xf32, #tpu.memory_space<vmem>>, vector<128x512xf32>
    %cst_21 = arith.constant dense<0.000000e+00> : vector<32x512xf32>
    %30 = tpu.matmul %28, %29, %cst_21 {dimension_numbers = #tpu.dot_dimension_numbers<[1], [0], [0], [1], [0, 0, 1, 1], [], []>} : vector<32x128xf32>, vector<128x512xf32>, vector<32x512xf32> -> vector<32x512xf32>
    %c0_22 = arith.constant 0 : index
    %c0_23 = arith.constant 0 : index
    %31 = vector.load %arg3[%c0_22, %c0_23] : memref<1x512xf32, #tpu.memory_space<vmem>>, vector<1x512xf32>
    %32 = vector.broadcast %31 : vector<1x512xf32> to vector<32x512xf32>
    %33 = arith.addf %30, %32 : vector<32x512xf32>
    %cst_24 = arith.constant 0.000000e+00 : f32
    %34 = vector.broadcast %cst_24 : f32 to vector<32x512xf32>
    %35 = arith.maximumf %33, %34 : vector<32x512xf32>
    %c0_25 = arith.constant 0 : index
    %c0_26 = arith.constant 0 : index
    %36 = vector.load %arg4[%c0_25, %c0_26] : memref<512x256xf32, #tpu.memory_space<vmem>>, vector<512x256xf32>
    %cst_27 = arith.constant dense<0.000000e+00> : vector<32x256xf32>
    %37 = tpu.matmul %35, %36, %cst_27 {dimension_numbers = #tpu.dot_dimension_numbers<[1], [0], [0], [1], [0, 0, 1, 1], [], []>} : vector<32x512xf32>, vector<512x256xf32>, vector<32x256xf32> -> vector<32x256xf32>
    %c0_28 = arith.constant 0 : index
    %c0_29 = arith.constant 0 : index
    %38 = vector.load %arg5[%c0_28, %c0_29] : memref<1x256xf32, #tpu.memory_space<vmem>>, vector<1x256xf32>
    %39 = vector.broadcast %38 : vector<1x256xf32> to vector<32x256xf32>
    %40 = arith.addf %37, %39 : vector<32x256xf32>
    %cst_30 = arith.constant 0.000000e+00 : f32
    %41 = vector.broadcast %cst_30 : f32 to vector<32x256xf32>
    %42 = arith.maximumf %40, %41 : vector<32x256xf32>
    %c0_31 = arith.constant 0 : index
    %c0_32 = arith.constant 0 : index
    %43 = vector.load %arg6[%c0_31, %c0_32] : memref<256x16xf32, #tpu.memory_space<vmem>>, vector<256x16xf32>
    %cst_33 = arith.constant dense<0.000000e+00> : vector<32x16xf32>
    %44 = tpu.matmul %42, %43, %cst_33 {dimension_numbers = #tpu.dot_dimension_numbers<[1], [0], [0], [1], [0, 0, 1, 1], [], []>} : vector<32x256xf32>, vector<256x16xf32>, vector<32x16xf32> -> vector<32x16xf32>
    %c0_34 = arith.constant 0 : index
    %c0_35 = arith.constant 0 : index
    %45 = vector.load %arg7[%c0_34, %c0_35] : memref<1x1xf32, #tpu.memory_space<vmem>>, vector<1x1xf32>
    %46 = vector.broadcast %45 : vector<1x1xf32> to vector<32x16xf32>
    %47 = arith.addf %44, %46 : vector<32x16xf32>
    %48 = arith.index_cast %26 : i32 to index
    %c0_36 = arith.constant 0 : index
    %49 = vector.load %arg8[%48, %c0_36] : memref<64x16xf32, #tpu.memory_space<vmem>>, vector<32x16xf32>
    tpu.vector_store %arg8[%48, %c0_36], %47 {strides = array<i32>} : memref<64x16xf32, #tpu.memory_space<vmem>>, vector<32x16xf32>,
    %c2_i32 = arith.constant 2 : i32
    return
  }
  func.func @transform_0(%arg0: i32) -> (i32, i32) {
    %c0_i32 = arith.constant 0 : i32
    %c0_i32_0 = arith.constant 0 : i32
    return %arg0, %c0_i32 : i32, i32
  }
  func.func @transform_1(%arg0: i32) -> (i32, i32) {
    %c0_i32 = arith.constant 0 : i32
    %c0_i32_0 = arith.constant 0 : i32
    %c0_i32_1 = arith.constant 0 : i32
    return %c0_i32, %c0_i32_0 : i32, i32
  }
  func.func @transform_2(%arg0: i32) -> (i32, i32) {
    %c0_i32 = arith.constant 0 : i32
    %c0_i32_0 = arith.constant 0 : i32
    %c0_i32_1 = arith.constant 0 : i32
    return %c0_i32, %c0_i32_0 : i32, i32
  }
  func.func @transform_3(%arg0: i32) -> (i32, i32) {
    %c0_i32 = arith.constant 0 : i32
    %c0_i32_0 = arith.constant 0 : i32
    %c0_i32_1 = arith.constant 0 : i32
    return %c0_i32, %c0_i32_0 : i32, i32
  }
  func.func @transform_4(%arg0: i32) -> (i32, i32) {
    %c0_i32 = arith.constant 0 : i32
    %c0_i32_0 = arith.constant 0 : i32
    %c0_i32_1 = arith.constant 0 : i32
    return %c0_i32, %c0_i32_0 : i32, i32
  }
  func.func @transform_5(%arg0: i32) -> (i32, i32) {
    %c0_i32 = arith.constant 0 : i32
    %c0_i32_0 = arith.constant 0 : i32
    %c0_i32_1 = arith.constant 0 : i32
    return %c0_i32, %c0_i32_0 : i32, i32
  }
  func.func @transform_6(%arg0: i32) -> (i32, i32) {
    %c0_i32 = arith.constant 0 : i32
    %c0_i32_0 = arith.constant 0 : i32
    %c0_i32_1 = arith.constant 0 : i32
    return %c0_i32, %c0_i32_0 : i32, i32
  }
  func.func @transform_7(%arg0: i32) -> (i32, i32) {
    %c0_i32 = arith.constant 0 : i32
    %c0_i32_0 = arith.constant 0 : i32
    return %arg0, %c0_i32 : i32, i32
  }
}

</mosaic_0001>

<bundles_post_ra>
// kernel: tpu_custom_call.1
= control target key start
LH: loop header
LB: loop body
LE: loop exit
PB: predicated region body
PF: predicated region fallthrough
CT: control target
= control target key end

     0   :  { %s3077_s0 = inlined_call_operand.vmem [shape: f32[192,128], index: 0, kind: input, shape index: {}]   ;;  %s3078_s1 = inlined_call_operand.hbm [shape: f32[128,512], index: 1, kind: input, shape index: {}]   ;;  %s3079_s2 = inlined_call_operand.vmem [shape: f32[1,512], index: 2, kind: input, shape index: {}]   ;;  %s3080_s3 = inlined_call_operand.hbm [shape: f32[512,256], index: 3, kind: input, shape index: {}]   ;;  %s3081_s4 = inlined_call_operand.vmem [shape: f32[1,256], index: 4, kind: input, shape index: {}]   ;;  %s3082_s5 = inlined_call_operand.vmem [shape: f32[256,16], index: 5, kind: input, shape index: {}]   ;;  %s3083_s6 = inlined_call_operand.<no memory space> [shape: f32[1,1], index: 6, kind: input, shape index: {}]   ;;  %s3084_s7 = inlined_call_operand.vmem [shape: f32[192,16], index: 7, kind: output, shape index: {}]  }
   0x1   :  { %v12_v0 = vstv %s3083_s6 }
   0x2   :  { %13 = vst [vmem:[#allocation2] sm:$0x1] %v12_v0 }
   0x3   :  { %14 = vsyncpa [#allocation4], 0 }
   0x4   :  { %15 = vsyncpa [#allocation6], 0  ;;  %s2629_s26 = smov 0  }
   0x5 LB: > { %s2578_s27 = smov [#allocation3]   ;;  %s1877_s29 = sadd.s32 4294967295, %s2576_s26   ;;  %s2576_s26 = sphi %s2629_s26, %s21_s26  }
   0x6   : > { %s216_s28 = sshll.u32 %s2578_s27, 4  ;;  %p1879_p0 = scmp.ge.s32.totalorder %s2576_s26, 1  ;;  %s217_s28 = int_to_ptr.vmem [resolvable:$true] %s216_s28 }
   0x7   : > { %p204_p1 = scmp.lt.s32.totalorder %s2576_s26, 4  ;;  %p2643_p3 = scmp.eq.s32.totalorder %s1877_s29, 0 }
   0x8   : > { %s2579_s8 = smov [#allocation5]   ;;  %s2506_s13 = scalar_lea.hbm %s3078_s1, 8192 }
   0x9   : > { %p2637_p2 = pnand %p1879_p0, %p204_p1  ;;  %s232_s9 = sshll.u32 %s2579_s8, 4  ;;  %s2655_s9 = int_to_ptr.vmem [resolvable:$true] %s232_s9 }
   0xa   : > { %s3089_s30 = scalar_select %p2643_p3, 1, 0 }
   0xb   : > { %s3088_s6 = scalar_select %p2637_p2, 1, 0 }
   0xc   : > { %p2478_p4 = pneg %p2637_p2  ;;  %p2507_p6 = scmp.ne.s32.totalorder %s3078_s1, %s2506_s13 }
   0xd   : > { %p2513_p10 = scmp.lt.u32.totalorder %s2506_s13, %s3078_s1 }
   0xe   : > { %p2651_p5 = pnand %p2643_p3, %p2478_p4 }
  0x10   : > { %p2508_p7 = pneg %p2651_p5 }
  0x12   : > { %p2509_p8 = pnand %p2508_p7, %p2507_p6 }
  0x14   : > { %p2510_p9 = pneg %p2509_p8 }
  0x16   : > { %p2515_p11 = pnand %p2513_p10, %p2510_p9 }
  0x18   : > { %2518 = shalt.err (!%p2515_p11)
}
  0x19   : > { %s2519_s18 = scalar_lea.vmem %s217_s28, 8192  ;;  %p2527_p1 = scmp.lt.s32.totalorder %s217_s28, %s217_s28 }
  0x1a   : > { %p2520_p12 = scmp.ne.s32.totalorder %s217_s28, %s2519_s18  ;;  %p2528_p4 = scmp.lt.s32.totalorder %s2519_s18, %s2519_s18 }
  0x1c   : > { %p2522_p13 = pnand %p2520_p12, %p2508_p7  ;;  %p2529_p3 = por %p2528_p4, %p2527_p1 }
  0x1e   : > { %p2523_p0 = pneg %p2522_p13 }
  0x20   : > { %p2530_p2 = pnand %p2529_p3, %p2523_p0 }
  0x22   : > { %2533 = shalt.err (!%p2530_p2)
}
  0x23   : > { %s2580_s19 = smov 512   ;;  %s2581_s20 = smov 32  }
  0x24   : > { %2481 = dma.hbm_to_vmem [thread:$0]  (!%p2651_p5), %s3078_s1, 8192, %s217_s28, [#allocation4], %s2580_s19, %s2580_s19, %s2581_s20  }
  0x25   : > { %s2534_s25 = scalar_lea.hbm %s3080_s3, 16384 }
  0x26   : > { %p2535_p6 = scmp.ne.s32.totalorder %s3080_s3, %s2534_s25  ;;  %p2541_p8 = scmp.lt.u32.totalorder %s2534_s25, %s3080_s3 }
  0x28   : > { %p2537_p2 = pnand %p2535_p6, %p2508_p7 }
  0x2a   : > { %p2538_p3 = pneg %p2537_p2 }
  0x2c   : > { %p2543_p9 = pnand %p2541_p8, %p2538_p3 }
  0x2e   : > { %2546 = shalt.err (!%p2543_p9)
}
  0x2f   : > { %s2547_s28 = scalar_lea.vmem %s2655_s9, 16384  ;;  %p2555_p13 = scmp.lt.s32.totalorder %s2655_s9, %s2655_s9 }
  0x30   : > { %p2548_p10 = scmp.ne.s32.totalorder %s2655_s9, %s2547_s28  ;;  %p2556_p0 = scmp.lt.s32.totalorder %s2547_s28, %s2547_s28 }
  0x32   : > { %p2550_p11 = pnand %p2548_p10, %p2508_p7  ;;  %p2557_p1 = por %p2556_p0, %p2555_p13 }
  0x34   : > { %p2551_p12 = pneg %p2550_p11 }
  0x36   : > { %p2558_p4 = pnand %p2557_p1, %p2551_p12 }
  0x38   : > { %2561 = shalt.err (!%p2558_p4)
}
  0x39   : > { %s2582_s13 = smov 256   ;;  %s2583_s14 = smov 16  }
  0x3a   : > { %2484 = dma.hbm_to_vmem [thread:$0]  (!%p2651_p5), %s3080_s3, 16384, %s2655_s9, [#allocation6], %s2582_s13, %s2582_s13, %s2583_s14  }
  0x3b   : > { %p3091_p6 = scmp.ne.s32.totalorder %s3088_s6, 0 }
  0x3c   : > { %p3092_p7 = scmp.ne.s32.totalorder (!%p3091_p6), %s3089_s30, 0 }
  0x3d   : > { %266 = sbr.rel (%p3091_p6) target bundleno = 1369 (0x559), region = 48 }
  0x44   : > { %2567 = dma.done.wait (%p3092_p7), [#allocation4], 8192  }
  0x45   : > { %2569 = vsyncadd (%p3092_p7), [#allocation4], 4294959104 }
  0x46   : > { %2571 = dma.done.wait (%p3092_p7), [#allocation6], 16384  }
  0x47   : > { %2573 = vsyncadd (%p3092_p7), [#allocation6], 4294950912  ;;  %v2584_v1 = vmov 0.0   ;;  %v319_v2 = vld [vmem:[#allocation3 + $0x8] sm:$0xff]  ;;  %v318_v4 = vld [vmem:[#allocation3] sm:$0xff]  ;;  %s1886_s6 = sshll.u32 %s1877_s29, 3 }
  0x48   : > { %468 = vmatprep.mubr.f32.mxu0 %v2584_v1  ;;  %v323_v3 = vld [vmem:[#allocation3 + $0x28] sm:$0xff]  ;;  %v322_v6 = vld [vmem:[#allocation3 + $0x20] sm:$0xff]  ;;  %p303_p5 = scmp.lt.s32.totalorder %s1886_s6, 23  ;;  %v321_v49 = vld [vmem:[#allocation3 + $0x18] sm:$0xff]  ;;  %vm1051_vm0 = vcmask 130048  }
  0x49   : > { %v1990_v5 = vpack.c.bf16 %v323_v3, %v319_v2  ;;  %v327_v7 = vld [vmem:[#allocation3 + $0x48] sm:$0xff]  ;;  %v1992_v9 = vpack.c.bf16 %v322_v6, %v318_v4  ;;  %v326_v11 = vld [vmem:[#allocation3 + $0x40] sm:$0xff]  ;;  %v325_v50 = vld [vmem:[#allocation3 + $0x38] sm:$0xff] }
  0x4a   : > { %v331_v8 = vld [vmem:[#allocation3 + $0x68] sm:$0xff]  ;;  %v330_v12 = vld [vmem:[#allocation3 + $0x60] sm:$0xff]  ;;  %s3094_s6 = smov (!%p303_p5, %s1886_s6), 23  ;;  %v2022_v52 = vpack.c.bf16 %v325_v50, %v321_v49  ;;  %v320_v53 = vld [vmem:[#allocation3 + $0x10] sm:$0xff] }
  0x4b   : > { %v1994_v10 = vpack.c.bf16 %v331_v8, %v327_v7  ;;  %v335_v13 = vld [vmem:[#allocation3 + $0x88] sm:$0xff]  ;;  %1991 = vmatprep.subr.bf16.mxu0 %v1990_v5  ;;  %v1996_v15 = vpack.c.bf16 %v330_v12, %v326_v11  ;;  %v334_v17 = vld [vmem:[#allocation3 + $0x80] sm:$0xff]  ;;  %s1887_s29 = sshll.u32 %s3094_s6, 3  ;;  %v324_v54 = vld [vmem:[#allocation3 + $0x30] sm:$0xff] }
  0x4c   : > { %v339_v14 = vld [vmem:[#allocation3 + $0xa8] sm:$0xff]  ;;  %1993 = vmatpush1.bf16.msra.mxu0 %v1992_v9  ;;  %v338_v18 = vld [vmem:[#allocation3 + $0xa0] sm:$0xff]  ;;  %s2725_s10 = scalar_lea.vmem %s3077_s0, %s1887_s29  ;;  %v329_v55 = vld [vmem:[#allocation3 + $0x58] sm:$0xff]  ;;  %v2024_v58 = vpack.c.bf16 %v324_v54, %v320_v53  ;;  %s2991_s11 = scalar_lea.vmem %s3084_s7, %s1887_s29 }
  0x4d   : > { %1995 = vmatprep.subr.bf16.mxu0 %v1994_v10  ;;  %v1998_v16 = vpack.c.bf16 %v339_v14, %v335_v13  ;;  %v343_v19 = vld [vmem:[#allocation3 + $0xc8] sm:$0xff]  ;;  %v2000_v21 = vpack.c.bf16 %v338_v18, %v334_v17  ;;  %v342_v23 = vld [vmem:[#allocation3 + $0xc0] sm:$0xff]  ;;  %v333_v56 = vld [vmem:[#allocation3 + $0x78] sm:$0xff] }
  0x4e   : > { %v347_v20 = vld [vmem:[#allocation3 + $0xe8] sm:$0xff]  ;;  %v346_v24 = vld [vmem:[#allocation3 + $0xe0] sm:$0xff]  ;;  %v2026_v59 = vpack.c.bf16 %v333_v56, %v329_v55  ;;  %v328_v60 = vld [vmem:[#allocation3 + $0x50] sm:$0xff] }
  0x4f   : > { %v2002_v22 = vpack.c.bf16 %v347_v20, %v343_v19  ;;  %v351_v25 = vld [vmem:[#allocation3 + $0x108] sm:$0xff]  ;;  %v2004_v27 = vpack.c.bf16 %v346_v24, %v342_v23  ;;  %v350_v29 = vld [vmem:[#allocation3 + $0x100] sm:$0xff]  ;;  %v332_v61 = vld [vmem:[#allocation3 + $0x70] sm:$0xff] }
  0x50   : > { %1997 = vmatpush1.bf16.msra.mxu0 %v1996_v15  ;;  %v355_v26 = vld [vmem:[#allocation3 + $0x128] sm:$0xff]  ;;  %v354_v30 = vld [vmem:[#allocation3 + $0x120] sm:$0xff]  ;;  %v337_v62 = vld [vmem:[#allocation3 + $0x98] sm:$0xff]  ;;  %v2028_v0 = vpack.c.bf16 %v332_v61, %v328_v60 }
  0x51   : > { %1999 = vmatprep.subr.bf16.mxu0 %v1998_v16  ;;  %v2006_v28 = vpack.c.bf16 %v355_v26, %v351_v25  ;;  %v359_v31 = vld [vmem:[#allocation3 + $0x148] sm:$0xff]  ;;  %v2008_v33 = vpack.c.bf16 %v354_v30, %v350_v29  ;;  %v358_v35 = vld [vmem:[#allocation3 + $0x140] sm:$0xff]  ;;  %v341_v63 = vld [vmem:[#allocation3 + $0xb8] sm:$0xff] }
  0x52   : > { %v363_v32 = vld [vmem:[#allocation3 + $0x168] sm:$0xff]  ;;  %v362_v36 = vld [vmem:[#allocation3 + $0x160] sm:$0xff]  ;;  %v2030_v3 = vpack.c.bf16 %v341_v63, %v337_v62  ;;  %v336_v4 = vld [vmem:[#allocation3 + $0x90] sm:$0xff] }
  0x53   : > { %v2010_v34 = vpack.c.bf16 %v363_v32, %v359_v31  ;;  %v367_v37 = vld [vmem:[#allocation3 + $0x188] sm:$0xff]  ;;  %v2012_v39 = vpack.c.bf16 %v362_v36, %v358_v35  ;;  %v366_v41 = vld [vmem:[#allocation3 + $0x180] sm:$0xff]  ;;  %v340_v5 = vld [vmem:[#allocation3 + $0xb0] sm:$0xff] }
  0x54   : > { %2001 = vmatpush1.bf16.msra.mxu0 %v2000_v21  ;;  %v371_v38 = vld [vmem:[#allocation3 + $0x1a8] sm:$0xff]  ;;  %v370_v42 = vld [vmem:[#allocation3 + $0x1a0] sm:$0xff]  ;;  %v345_v6 = vld [vmem:[#allocation3 + $0xd8] sm:$0xff]  ;;  %v2032_v8 = vpack.c.bf16 %v340_v5, %v336_v4 }
  0x55   : > { %2003 = vmatprep.subr.bf16.mxu0 %v2002_v22  ;;  %v2014_v40 = vpack.c.bf16 %v371_v38, %v367_v37  ;;  %v375_v43 = vld [vmem:[#allocation3 + $0x1c8] sm:$0xff]  ;;  %v2016_v45 = vpack.c.bf16 %v370_v42, %v366_v41  ;;  %v374_v47 = vld [vmem:[#allocation3 + $0x1c0] sm:$0xff]  ;;  %v349_v7 = vld [vmem:[#allocation3 + $0xf8] sm:$0xff] }
  0x56   : > { %v379_v44 = vld [vmem:[#allocation3 + $0x1e8] sm:$0xff]  ;;  %v378_v48 = vld [vmem:[#allocation3 + $0x1e0] sm:$0xff]  ;;  %v2034_v10 = vpack.c.bf16 %v349_v7, %v345_v6  ;;  %v344_v11 = vld [vmem:[#allocation3 + $0xd0] sm:$0xff] }
  0x57   : > { %v2018_v46 = vpack.c.bf16 %v379_v44, %v375_v43  ;;  %v2020_v51 = vpack.c.bf16 %v378_v48, %v374_v47  ;;  %v2728_v57 = vld [vmem:[%s2725_s10] sm:$0xff]  ;;  %v2733_v2 = vld [vmem:[%s2725_s10 + $0x8] sm:$0xff]  ;;  %v2738_v9 = vld [vmem:[%s2725_s10 + $0x10] sm:$0xff] }
  0x58   : > { %2005 = vmatpush1.bf16.msra.mxu0 %v2004_v27  ;;  %v348_v12 = vld [vmem:[#allocation3 + $0xf0] sm:$0xff]  ;;  %v353_v13 = vld [vmem:[#allocation3 + $0x118] sm:$0xff]  ;;  %v599_v38 = vld [vmem:[#allocation5 + $0x8] sm:$0xff] }
  0x59   : > { %2007 = vmatprep.subr.bf16.mxu0 %v2006_v28  ;;  %v357_v14 = vld [vmem:[#allocation3 + $0x138] sm:$0xff]  ;;  %v2036_v15 = vpack.c.bf16 %v348_v12, %v344_v11  ;;  %v352_v18 = vld [vmem:[#allocation3 + $0x110] sm:$0xff]  ;;  %v598_v42 = vld [vmem:[#allocation5] sm:$0xff] }
  0x5a   : > { %v2743_v16 = vld [vmem:[%s2725_s10 + $0x18] sm:$0xff]  ;;  %v2038_v17 = vpack.c.bf16 %v357_v14, %v353_v13  ;;  %v603_v44 = vld [vmem:[#allocation5 + $0x28] sm:$0xff]  ;;  %v602_v48 = vld [vmem:[#allocation5 + $0x20] sm:$0xff] }
  0x5b   : > { %v356_v19 = vld [vmem:[#allocation3 + $0x130] sm:$0xff]  ;;  %v361_v20 = vld [vmem:[#allocation3 + $0x158] sm:$0xff]  ;;  %v607_v50 = vld [vmem:[#allocation5 + $0x48] sm:$0xff] }
  0x5c   : > { %2009 = vmatpush1.bf16.msra.mxu0 %v2008_v33  ;;  %v365_v21 = vld [vmem:[#allocation3 + $0x178] sm:$0xff]  ;;  %v2040_v22 = vpack.c.bf16 %v356_v19, %v352_v18  ;;  %v360_v24 = vld [vmem:[#allocation3 + $0x150] sm:$0xff]  ;;  %v606_v54 = vld [vmem:[#allocation5 + $0x40] sm:$0xff] }
  0x5d   : > { %2011 = vmatprep.subr.bf16.mxu0 %v2010_v34  ;;  %v2042_v23 = vpack.c.bf16 %v365_v21, %v361_v20  ;;  %v364_v25 = vld [vmem:[#allocation3 + $0x170] sm:$0xff]  ;;  %v369_v26 = vld [vmem:[#allocation3 + $0x198] sm:$0xff]  ;;  %v611_v56 = vld [vmem:[#allocation5 + $0x68] sm:$0xff] }
  0x5e   : > { %v373_v27 = vld [vmem:[#allocation3 + $0x1b8] sm:$0xff]  ;;  %v2044_v28 = vpack.c.bf16 %v364_v25, %v360_v24  ;;  %v368_v30 = vld [vmem:[#allocation3 + $0x190] sm:$0xff]  ;;  %v610_v61 = vld [vmem:[#allocation5 + $0x60] sm:$0xff] }
  0x5f   : > { %v2046_v29 = vpack.c.bf16 %v373_v27, %v369_v26  ;;  %v372_v31 = vld [vmem:[#allocation3 + $0x1b0] sm:$0xff]  ;;  %v377_v32 = vld [vmem:[#allocation3 + $0x1d8] sm:$0xff]  ;;  %v615_v62 = vld [vmem:[#allocation5 + $0x88] sm:$0xff] }
  0x60   : > { %2013 = vmatpush1.bf16.msra.mxu0 %v2012_v39  ;;  %v381_v33 = vld [vmem:[#allocation3 + $0x1f8] sm:$0xff]  ;;  %v2048_v34 = vpack.c.bf16 %v372_v31, %v368_v30  ;;  %v376_v36 = vld [vmem:[#allocation3 + $0x1d0] sm:$0xff]  ;;  %v614_v4 = vld [vmem:[#allocation5 + $0x80] sm:$0xff] }
  0x61   : > { %2015 = vmatprep.subr.bf16.mxu0 %v2014_v40  ;;  %v2050_v35 = vpack.c.bf16 %v381_v33, %v377_v32  ;;  %v380_v37 = vld [vmem:[#allocation3 + $0x1f0] sm:$0xff]  ;;  %v601_v39 = vld [vmem:[#allocation5 + $0x18] sm:$0xff]  ;;  %v619_v5 = vld [vmem:[#allocation5 + $0xa8] sm:$0xff] }
  0x62   : > { %v2052_v40 = vpack.c.bf16 %v380_v37, %v376_v36  ;;  %v2054_v41 = vpack.c.bf16 %v601_v39, %v599_v38  ;;  %v600_v43 = vld [vmem:[#allocation5 + $0x10] sm:$0xff]  ;;  %v617_v63 = vld [vmem:[#allocation5 + $0x98] sm:$0xff]  ;;  %v623_v12 = vld [vmem:[#allocation5 + $0xc8] sm:$0xff] }
  0x63   : > { %v604_v49 = vld [vmem:[#allocation5 + $0x30] sm:$0xff]  ;;  %v621_v6 = vld [vmem:[#allocation5 + $0xb8] sm:$0xff]  ;;  %v627_v18 = vld [vmem:[#allocation5 + $0xe8] sm:$0xff] }
  0x64   : > { %2017 = vmatpush1.bf16.msra.mxu0 %v2016_v45  ;;  %v605_v45 = vld [vmem:[#allocation5 + $0x38] sm:$0xff]  ;;  %v608_v55 = vld [vmem:[#allocation5 + $0x50] sm:$0xff]  ;;  %v626_v21 = vld [vmem:[#allocation5 + $0xe0] sm:$0xff] }
  0x65   : > { %2019 = vmatprep.subr.bf16.mxu0 %v2018_v46  ;;  %v2056_v46 = vpack.c.bf16 %v600_v43, %v598_v42  ;;  %v2058_v47 = vpack.c.bf16 %v605_v45, %v603_v44  ;;  %v620_v11 = vld [vmem:[#allocation5 + $0xb0] sm:$0xff]  ;;  %v629_v19 = vld [vmem:[#allocation5 + $0xf8] sm:$0xff]  ;;  %v630_v27 = vld [vmem:[#allocation5 + $0x100] sm:$0xff] }
  0x66   : > { %v633_v24 = vld [vmem:[#allocation5 + $0x118] sm:$0xff]  ;;  %v634_v33 = vld [vmem:[#allocation5 + $0x120] sm:$0xff] }
  0x67   : > { %v637_v30 = vld [vmem:[#allocation5 + $0x138] sm:$0xff]  ;;  %v638_v39 = vld [vmem:[#allocation5 + $0x140] sm:$0xff] }
  0x68   : > { %2021 = vmatpush1.bf16.msra.mxu0 %v2020_v51  ;;  %v609_v51 = vld [vmem:[#allocation5 + $0x58] sm:$0xff]  ;;  %v642_v45 = vld [vmem:[#allocation5 + $0x160] sm:$0xff] }
  0x69   : > { %2023 = vmatprep.subr.bf16.mxu0 %v2022_v52  ;;  %v2060_v52 = vpack.c.bf16 %v604_v49, %v602_v48  ;;  %v2062_v53 = vpack.c.bf16 %v609_v51, %v607_v50  ;;  %v641_v36 = vld [vmem:[#allocation5 + $0x158] sm:$0xff]  ;;  %v646_v51 = vld [vmem:[#allocation5 + $0x180] sm:$0xff] }
  0x6a   : > { %v645_v42 = vld [vmem:[#allocation5 + $0x178] sm:$0xff] }
  0x6b   : > { %469 = vmatmul.mubr.f32.vlgmr.msra.gmra.mrb[0].mxu0 %v2728_v57  ;;  %v649_v48 = vld [vmem:[#allocation5 + $0x198] sm:$0xff] }
  0x6c   : > { %2025 = vmatpush1.bf16.msra.mxu0 %v2024_v58  ;;  %474 = vmatprep.mubr.f32.mxu0 %v2584_v1  ;;  %v613_v58 = vld [vmem:[#allocation5 + $0x78] sm:$0xff] }
  0x6d   : > { %2027 = vmatprep.subr.bf16.mxu0 %v2026_v59  ;;  %v2064_v59 = vpack.c.bf16 %v608_v55, %v606_v54  ;;  %v2066_v60 = vpack.c.bf16 %v613_v58, %v611_v56  ;;  %v653_v54 = vld [vmem:[#allocation5 + $0x1b8] sm:$0xff]  ;;  %v650_v58 = vld [vmem:[#allocation5 + $0x1a0] sm:$0xff] }
  0x6f   : > { %475 = vmatmul.mubr.f32.gmra.mrb[2].mxu0 %v2733_v2 }
  0x70   : > { %2029 = vmatpush1.bf16.msra.mxu0 %v2028_v0  ;;  %480 = vmatprep.mubr.f32.mxu0 %v2584_v1 }
  0x71   : > { %2031 = vmatprep.subr.bf16.mxu0 %v2030_v3  ;;  %v2070_v3 = vpack.c.bf16 %v617_v63, %v615_v62  ;;  %v654_v63 = vld [vmem:[#allocation5 + $0x1c0] sm:$0xff] }
  0x73   : > { %481 = vmatmul.mubr.f32.gmra.mrb[4].mxu0 %v2738_v9 }
  0x74   : > { %2033 = vmatpush1.bf16.msra.mxu0 %v2032_v8  ;;  %486 = vmatprep.mubr.f32.mxu0 %v2584_v1  ;;  %v2074_v8 = vpack.c.bf16 %v621_v6, %v619_v5  ;;  %v658_v6 = vld [vmem:[#allocation5 + $0x1e0] sm:$0xff] }
  0x75   : > { %2035 = vmatprep.subr.bf16.mxu0 %v2034_v10  ;;  %v618_v10 = vld [vmem:[#allocation5 + $0xa0] sm:$0xff] }
  0x76   : > { %v2076_v13 = vpack.c.bf16 %v620_v11, %v618_v10  ;;  %v665_v10 = vld [vmem:[#allocation5 + $0x218] sm:$0xff] }
  0x77   : > { %487 = vmatmul.mubr.f32.gmra.mrb[6].mxu0 %v2743_v16 }
  0x78   : > { %2037 = vmatpush1.bf16.msra.mxu0 %v2036_v15  ;;  %557 = vmatprep.mubr.f32.mxu0 %v2584_v1  ;;  %v622_v15 = vld [vmem:[#allocation5 + $0xc0] sm:$0xff] }
  0x79   : > { %2039 = vmatprep.subr.bf16.mxu0 %v2038_v17  ;;  %v624_v17 = vld [vmem:[#allocation5 + $0xd0] sm:$0xff] }
  0x7a   : > { %v2080_v20 = vpack.c.bf16 %v624_v17, %v622_v15  ;;  %v925_v17 = vld [vmem:[%s3082_s5 + $0x8] sm:$0xff] }
  0x7c   : > { %2041 = vmatpush1.bf16.msra.mxu0 %v2040_v22  ;;  %v628_v22 = vld [vmem:[#allocation5 + $0xf0] sm:$0xff] }
  0x7d   : > { %2043 = vmatprep.subr.bf16.mxu0 %v2042_v23  ;;  %v631_v23 = vld [vmem:[#allocation5 + $0x108] sm:$0xff]  ;;  %v2084_v25 = vpack.c.bf16 %v628_v22, %v626_v21  ;;  %v927_v22 = vld [vmem:[%s3082_s5 + $0x18] sm:$0xff] }
  0x7e   : > { %v2086_v26 = vpack.c.bf16 %v633_v24, %v631_v23  ;;  %v926_v21 = vld [vmem:[%s3082_s5 + $0x10] sm:$0xff]  ;;  %v944_v23 = vld [vmem:[%s3082_s5 + $0xa0] sm:$0xff]  ;;  %v945_v24 = vld [vmem:[%s3082_s5 + $0xa8] sm:$0xff] }
  0x80   : > { %2045 = vmatpush1.bf16.msra.mxu0 %v2044_v28  ;;  %v632_v28 = vld [vmem:[#allocation5 + $0x110] sm:$0xff] }
  0x81   : > { %2047 = vmatprep.subr.bf16.mxu0 %v2046_v29  ;;  %v635_v29 = vld [vmem:[#allocation5 + $0x128] sm:$0xff]  ;;  %v2088_v31 = vpack.c.bf16 %v632_v28, %v630_v27  ;;  %v928_v27 = vld [vmem:[%s3082_s5 + $0x20] sm:$0xff] }
  0x82   : > { %v2090_v32 = vpack.c.bf16 %v637_v30, %v635_v29  ;;  %v929_v28 = vld [vmem:[%s3082_s5 + $0x28] sm:$0xff]  ;;  %v946_v29 = vld [vmem:[%s3082_s5 + $0xb0] sm:$0xff]  ;;  %v947_v30 = vld [vmem:[%s3082_s5 + $0xb8] sm:$0xff] }
  0x84   : > { %2049 = vmatpush1.bf16.msra.mxu0 %v2048_v34  ;;  %v636_v34 = vld [vmem:[#allocation5 + $0x130] sm:$0xff] }
  0x85   : > { %2051 = vmatprep.subr.bf16.mxu0 %v2050_v35  ;;  %v639_v35 = vld [vmem:[#allocation5 + $0x148] sm:$0xff]  ;;  %v2092_v37 = vpack.c.bf16 %v636_v34, %v634_v33  ;;  %v931_v34 = vld [vmem:[%s3082_s5 + $0x38] sm:$0xff] }
  0x86   : > { %v2094_v38 = vpack.c.bf16 %v641_v36, %v639_v35  ;;  %v930_v33 = vld [vmem:[%s3082_s5 + $0x30] sm:$0xff]  ;;  %v948_v35 = vld [vmem:[%s3082_s5 + $0xc0] sm:$0xff]  ;;  %v949_v36 = vld [vmem:[%s3082_s5 + $0xc8] sm:$0xff] }
  0x88   : > { %2053 = vmatpush1.bf16.msra.mxu0 %v2052_v40  ;;  %v640_v40 = vld [vmem:[#allocation5 + $0x150] sm:$0xff] }
  0x89   : > { %2055 = vmatprep.subr.bf16.mxu0 %v2054_v41  ;;  %v643_v41 = vld [vmem:[#allocation5 + $0x168] sm:$0xff]  ;;  %v2096_v43 = vpack.c.bf16 %v640_v40, %v638_v39  ;;  %v932_v39 = vld [vmem:[%s3082_s5 + $0x40] sm:$0xff] }
  0x8a   : > { %v2098_v44 = vpack.c.bf16 %v645_v42, %v643_v41  ;;  %v933_v40 = vld [vmem:[%s3082_s5 + $0x48] sm:$0xff]  ;;  %v950_v41 = vld [vmem:[%s3082_s5 + $0xd0] sm:$0xff]  ;;  %v951_v42 = vld [vmem:[%s3082_s5 + $0xd8] sm:$0xff] }
  0x8b   : > { %558 = vmatmul.mubr.f32.vlgmr.msra.gmra.mrb[8].mxu0 %v2728_v57  ;;  %v612_v57 = vld [vmem:[#allocation5 + $0x70] sm:$0xff] }
  0x8c   : > { %563 = vmatprep.mubr.f32.mxu0 %v2584_v1  ;;  %2057 = vmatpush1.bf16.msra.mxu0 %v2056_v46  ;;  %v2068_v0 = vpack.c.bf16 %v612_v57, %v610_v61  ;;  %v644_v46 = vld [vmem:[#allocation5 + $0x170] sm:$0xff]  ;;  %v657_v61 = vld [vmem:[#allocation5 + $0x1d8] sm:$0xff] }
  0x8d   : > { %2059 = vmatprep.subr.bf16.mxu0 %v2058_v47  ;;  %v647_v47 = vld [vmem:[#allocation5 + $0x188] sm:$0xff]  ;;  %v2100_v49 = vpack.c.bf16 %v644_v46, %v642_v45  ;;  %v935_v46 = vld [vmem:[%s3082_s5 + $0x58] sm:$0xff] }
  0x8e   : > { %v2102_v50 = vpack.c.bf16 %v649_v48, %v647_v47  ;;  %v934_v45 = vld [vmem:[%s3082_s5 + $0x50] sm:$0xff]  ;;  %v952_v47 = vld [vmem:[%s3082_s5 + $0xe0] sm:$0xff]  ;;  %v953_v48 = vld [vmem:[%s3082_s5 + $0xe8] sm:$0xff] }
  0x8f   : > { %564 = vmatmul.mubr.f32.gmra.mrb[10].mxu0 %v2733_v2  ;;  %v616_v2 = vld [vmem:[#allocation5 + $0x90] sm:$0xff] }
  0x90   : > { %569 = vmatprep.mubr.f32.mxu0 %v2584_v1  ;;  %2061 = vmatpush1.bf16.msra.mxu0 %v2060_v52  ;;  %v2072_v7 = vpack.c.bf16 %v616_v2, %v614_v4  ;;  %v648_v52 = vld [vmem:[#allocation5 + $0x190] sm:$0xff]  ;;  %v661_v4 = vld [vmem:[#allocation5 + $0x1f8] sm:$0xff] }
  0x91   : > { %2063 = vmatprep.subr.bf16.mxu0 %v2062_v53  ;;  %v651_v53 = vld [vmem:[#allocation5 + $0x1a8] sm:$0xff]  ;;  %v2104_v55 = vpack.c.bf16 %v648_v52, %v646_v51  ;;  %v936_v51 = vld [vmem:[%s3082_s5 + $0x60] sm:$0xff] }
  0x92   : > { %v2106_v56 = vpack.c.bf16 %v653_v54, %v651_v53  ;;  %v937_v52 = vld [vmem:[%s3082_s5 + $0x68] sm:$0xff]  ;;  %v384_v54 = vlaneseq }
  0x93   : > { %570 = vmatmul.mubr.f32.gmra.mrb[12].mxu0 %v2738_v9  ;;  %v625_v9 = vld [vmem:[#allocation5 + $0xd8] sm:$0xff]  ;;  %v2208_v53 = vpack.c.bf16 %v937_v52, %v936_v51  ;;  %v682_v52 = vld [vmem:[#allocation5 + $0x2a0] sm:$0xff] }
  0x94   : > { %575 = vmatprep.mubr.f32.mxu0 %v2584_v1  ;;  %2065 = vmatpush1.bf16.msra.mxu0 %v2064_v59  ;;  %v2078_v14 = vpack.c.bf16 %v625_v9, %v623_v12  ;;  %v652_v59 = vld [vmem:[#allocation5 + $0x1b0] sm:$0xff]  ;;  %v940_v9 = vld [vmem:[%s3082_s5 + $0x80] sm:$0xff] }
  0x95   : > { %2067 = vmatprep.subr.bf16.mxu0 %v2066_v60  ;;  %v655_v60 = vld [vmem:[#allocation5 + $0x1c8] sm:$0xff]  ;;  %v2108_v57 = vpack.c.bf16 %v652_v59, %v650_v58  ;;  %v2846_v58 = vld [vmem:[%s3079_s2] sm:$0xf] }
  0x96   : > { %v2110_v62 = vpack.c.bf16 %v657_v61, %v655_v60 }
  0x97   : > { %576 = vmatmul.mubr.f32.gmra.mrb[14].mxu0 %v2743_v16  ;;  %v2082_v16 = vpack.c.bf16 %v629_v19, %v627_v18  ;;  %v942_v18 = vld [vmem:[%s3082_s5 + $0x90] sm:$0xff]  ;;  %v943_v19 = vld [vmem:[%s3082_s5 + $0x98] sm:$0xff] }
  0x98   : > { %2069 = vmatpush1.bf16.msra.mxu0 %v2068_v0  ;;  %v656_v0 = vld [vmem:[#allocation5 + $0x1d0] sm:$0xff] }
  0x99   : > { %2071 = vmatprep.subr.bf16.mxu0 %v2070_v3  ;;  %v659_v3 = vld [vmem:[#allocation5 + $0x1e8] sm:$0xff]  ;;  %v2112_v2 = vpack.c.bf16 %v656_v0, %v654_v63  ;;  %v662_v0 = vld [vmem:[#allocation5 + $0x200] sm:$0xff] }
  0x9a   : > { %v2114_v5 = vpack.c.bf16 %v661_v4, %v659_v3  ;;  %v664_v3 = vld [vmem:[#allocation5 + $0x210] sm:$0xff] }
  0x9c   : > { %2073 = vmatpush1.bf16.msra.mxu0 %v2072_v7  ;;  %v660_v7 = vld [vmem:[#allocation5 + $0x1f0] sm:$0xff] }
  0x9d   : > { %2075 = vmatprep.subr.bf16.mxu0 %v2074_v8  ;;  %v663_v8 = vld [vmem:[#allocation5 + $0x208] sm:$0xff]  ;;  %v2116_v11 = vpack.c.bf16 %v660_v7, %v658_v6  ;;  %v2120_v7 = vpack.c.bf16 %v664_v3, %v662_v0  ;;  %v693_v3 = vld [vmem:[#allocation5 + $0x2f8] sm:$0xff] }
  0x9e   : > { %v2118_v12 = vpack.c.bf16 %v665_v10, %v663_v8  ;;  %v691_v0 = vld [vmem:[#allocation5 + $0x2e8] sm:$0xff] }
  0xa0   : > { %2077 = vmatpush1.bf16.msra.mxu0 %v2076_v13  ;;  %v941_v13 = vld [vmem:[%s3082_s5 + $0x88] sm:$0xff] }
  0xa1   : > { %2079 = vmatprep.subr.bf16.mxu0 %v2078_v14  ;;  %v924_v14 = vld [vmem:[%s3082_s5] sm:$0xff]  ;;  %v2182_v15 = vpack.c.bf16 %v941_v13, %v940_v9  ;;  %v668_v9 = vld [vmem:[#allocation5 + $0x230] sm:$0xff] }
  0xa3   : > { %2183 = vmatprep.subr.bf16.mxu1 %v2182_v15  ;;  %v671_v15 = vld [vmem:[#allocation5 + $0x248] sm:$0xff] }
  0xa4   : > { %2081 = vmatpush1.bf16.msra.mxu0 %v2080_v20  ;;  %v2184_v20 = vpack.c.bf16 %v925_v17, %v924_v14  ;;  %v673_v17 = vld [vmem:[#allocation5 + $0x258] sm:$0xff] }
  0xa5   : > { %2083 = vmatprep.subr.bf16.mxu0 %v2082_v16  ;;  %v2186_v16 = vpack.c.bf16 %v943_v19, %v942_v18 }
  0xa6   : > { %2185 = vmatpush3.bf16.msra.mxu1 %v2184_v20 }
  0xa7   : > { %2187 = vmatprep.subr.bf16.mxu1 %v2186_v16 }
  0xa8   : > { %2085 = vmatpush1.bf16.msra.mxu0 %v2084_v25  ;;  %v2188_v25 = vpack.c.bf16 %v927_v22, %v926_v21  ;;  %v2126_v22 = vpack.c.bf16 %v673_v17, %v671_v15  ;;  %v696_v15 = vld [vmem:[#allocation5 + $0x310] sm:$0xff] }
  0xa9   : > { %2087 = vmatprep.subr.bf16.mxu0 %v2086_v26  ;;  %v2190_v26 = vpack.c.bf16 %v945_v24, %v944_v23  ;;  %v670_v23 = vld [vmem:[#allocation5 + $0x240] sm:$0xff]  ;;  %v672_v24 = vld [vmem:[#allocation5 + $0x250] sm:$0xff] }
  0xaa   : > { %2189 = vmatpush3.bf16.msra.mxu1 %v2188_v25 }
  0xab   : > { %2191 = vmatprep.subr.bf16.mxu1 %v2190_v26 }
  0xac   : > { %2089 = vmatpush1.bf16.msra.mxu0 %v2088_v31  ;;  %v2192_v31 = vpack.c.bf16 %v929_v28, %v928_v27  ;;  %v675_v27 = vld [vmem:[#allocation5 + $0x268] sm:$0xff]  ;;  %v677_v28 = vld [vmem:[#allocation5 + $0x278] sm:$0xff] }
  0xad   : > { %2091 = vmatprep.subr.bf16.mxu0 %v2090_v32  ;;  %v2194_v32 = vpack.c.bf16 %v947_v30, %v946_v29 }
  0xae   : > { %2193 = vmatpush3.bf16.msra.mxu1 %v2192_v31  ;;  %v2128_v31 = vpack.c.bf16 %v672_v24, %v670_v23  ;;  %v698_v24 = vld [vmem:[#allocation5 + $0x320] sm:$0xff] }
  0xaf   : > { %2195 = vmatprep.subr.bf16.mxu1 %v2194_v32 }
  0xb0   : > { %2093 = vmatpush1.bf16.msra.mxu0 %v2092_v37  ;;  %v2196_v37 = vpack.c.bf16 %v931_v34, %v930_v33  ;;  %v2130_v34 = vpack.c.bf16 %v677_v28, %v675_v27  ;;  %v703_v27 = vld [vmem:[#allocation5 + $0x348] sm:$0xff]  ;;  %v705_v28 = vld [vmem:[#allocation5 + $0x358] sm:$0xff] }
  0xb1   : > { %2095 = vmatprep.subr.bf16.mxu0 %v2094_v38  ;;  %v2198_v38 = vpack.c.bf16 %v949_v36, %v948_v35  ;;  %v674_v35 = vld [vmem:[#allocation5 + $0x260] sm:$0xff]  ;;  %v676_v36 = vld [vmem:[#allocation5 + $0x270] sm:$0xff] }
  0xb2   : > { %2197 = vmatpush3.bf16.msra.mxu1 %v2196_v37 }
  0xb3   : > { %2199 = vmatprep.subr.bf16.mxu1 %v2198_v38 }
  0xb4   : > { %2097 = vmatpush1.bf16.msra.mxu0 %v2096_v43  ;;  %v2200_v43 = vpack.c.bf16 %v933_v40, %v932_v39  ;;  %v679_v39 = vld [vmem:[#allocation5 + $0x288] sm:$0xff]  ;;  %v681_v40 = vld [vmem:[#allocation5 + $0x298] sm:$0xff] }
  0xb5   : > { %2099 = vmatprep.subr.bf16.mxu0 %v2098_v44  ;;  %v2202_v44 = vpack.c.bf16 %v951_v42, %v950_v41 }
  0xb6   : > { %2201 = vmatpush3.bf16.msra.mxu1 %v2200_v43  ;;  %v2132_v43 = vpack.c.bf16 %v676_v36, %v674_v35  ;;  %v707_v35 = vld [vmem:[#allocation5 + $0x368] sm:$0xff]  ;;  %v709_v36 = vld [vmem:[#allocation5 + $0x378] sm:$0xff] }
  0xb7   : > { %2203 = vmatprep.subr.bf16.mxu1 %v2202_v44 }
  0xb8   : > { %2101 = vmatpush1.bf16.msra.mxu0 %v2100_v49  ;;  %v2204_v49 = vpack.c.bf16 %v935_v46, %v934_v45  ;;  %v2134_v45 = vpack.c.bf16 %v681_v40, %v679_v39  ;;  %v678_v46 = vld [vmem:[#allocation5 + $0x280] sm:$0xff]  ;;  %v2162_v39 = vpack.c.bf16 %v709_v36, %v707_v35  ;;  %v1890_v35 = vld [vmem:[#allocation2] ss:$0 sm:$0xff] }
  0xb9   : > { %2103 = vmatprep.subr.bf16.mxu0 %v2102_v50  ;;  %v2206_v50 = vpack.c.bf16 %v953_v48, %v952_v47  ;;  %v680_v47 = vld [vmem:[#allocation5 + $0x290] sm:$0xff]  ;;  %v683_v48 = vld [vmem:[#allocation5 + $0x2a8] sm:$0xff]  ;;  %v706_v40 = vld [vmem:[#allocation5 + $0x360] sm:$0xff] }
  0xba   : > { %2205 = vmatpush3.bf16.msra.mxu1 %v2204_v49  ;;  %v685_v49 = vld [vmem:[#allocation5 + $0x2b8] sm:$0xff] }
  0xbb   : > { %2207 = vmatprep.subr.bf16.mxu1 %v2206_v50  ;;  %v2136_v50 = vpack.c.bf16 %v680_v47, %v678_v46  ;;  %v2138_v51 = vpack.c.bf16 %v685_v49, %v683_v48  ;;  %v710_v47 = vld [vmem:[#allocation5 + $0x380] sm:$0xff]  ;;  %v712_v48 = vld [vmem:[#allocation5 + $0x390] sm:$0xff]  ;;  %v715_v49 = vld [vmem:[#allocation5 + $0x3a8] sm:$0xff] }
  0xbc   : > { %2105 = vmatpush1.bf16.msra.mxu0 %v2104_v55  ;;  %v2838_v55 = vshrl.u32 %v384_v54, 7  ;;  %v687_v54 = vld [vmem:[#allocation5 + $0x2c8] sm:$0xff]  ;;  %v726_v36 = vld [vmem:[%s3081_s4] sm:$0x3] }
  0xbd   : > { %2107 = vmatprep.subr.bf16.mxu0 %v2106_v56 }
  0xbe   : > { %2209 = vmatpush3.bf16.msra.mxu1 %v2208_v53  ;;  %v2841_v56 = vsub.s32 0, %v2838_v55  ;;  %v2849_v59 = vsub.s32 1, %v2838_v55  ;;  %v684_v53 = vld [vmem:[#allocation5 + $0x2b0] sm:$0xff] }
  0xc0   : > { %2109 = vmatpush1.bf16.msra.mxu0 %v2108_v57  ;;  %v387_v60 = vrot.slane %v2846_v58, %v2841_v56  ;;  %v391_v61 = vrot.slane %v2846_v58, %v2849_v59 }
  0xc1   : > { %2111 = vmatprep.subr.bf16.mxu0 %v2110_v62 }
  0xc4   : > { %2113 = vmatpush1.bf16.msra.mxu0 %v2112_v2  ;;  %v667_v2 = vld [vmem:[#allocation5 + $0x228] sm:$0xff] }
  0xc5   : > { %2115 = vmatprep.subr.bf16.mxu0 %v2114_v5  ;;  %v669_v5 = vld [vmem:[#allocation5 + $0x238] sm:$0xff] }
  0xc8   : > { %2117 = vmatpush1.bf16.msra.mxu0 %v2116_v11  ;;  %v2122_v11 = vpack.c.bf16 %v669_v5, %v667_v2  ;;  %v2146_v5 = vpack.c.bf16 %v693_v3, %v691_v0  ;;  %v718_v0 = vld [vmem:[#allocation5 + $0x3c0] sm:$0xff]  ;;  %v720_v3 = vld [vmem:[#allocation5 + $0x3d0] sm:$0xff] }
  0xc9   : > { %2119 = vmatprep.subr.bf16.mxu0 %v2118_v12  ;;  %v666_v12 = vld [vmem:[#allocation5 + $0x220] sm:$0xff] }
  0xca   : > { %v2124_v20 = vpack.c.bf16 %v668_v9, %v666_v12 }
 0x13e   : > { %v470_v57 = vpop.f32.mrb[0].mxu0 }
 0x13f   : > { %v471_v62 = vadd.f32 %v470_v57, %v387_v60  ;;  %v472_v63 = vpop.f32.mrb[1].mxu0 }
 0x140   : > { %v473_v4 = vadd.f32 %v472_v63, %v391_v61  ;;  %v688_v63 = vld [vmem:[#allocation5 + $0x2d0] sm:$0xff] }
 0x141   : > { %v582_v10 = vmax.f32 %v471_v62, 0.0  ;;  %v686_v62 = vld [vmem:[#allocation5 + $0x2c0] sm:$0xff] }
 0x142   : > { %v583_v6 = vmax.f32 %v473_v4, 0.0  ;;  %v476_v8 = vpop.f32.mrb[2].mxu0  ;;  %v398_v4 = vsub.s32 3, %v2838_v55  ;;  %v2144_v2 = vpack.c.bf16 %v688_v63, %v686_v62  ;;  %v394_v62 = vsub.s32 2, %v2838_v55 }
 0x143   : > { %v477_v13 = vadd.f32 %v476_v8, %v387_v60  ;;  %v478_v14 = vpop.f32.mrb[3].mxu0  ;;  %v695_v8 = vld [vmem:[#allocation5 + $0x308] sm:$0xff] }
 0x144   : > { %802 = vmatprep.mubr.f32.mxu0 %v583_v6  ;;  %v479_v18 = vadd.f32 %v478_v14, %v391_v61  ;;  %v690_v6 = vld [vmem:[#allocation5 + $0x2e0] sm:$0xff] }
 0x145   : > { %803 = vmatmul.mubr.f32.vlgmr.msra.gmra.mrb[16].mxu0 %v582_v10  ;;  %v586_v19 = vmax.f32 %v477_v13, 0.0  ;;  %v697_v10 = vld [vmem:[#allocation5 + $0x318] sm:$0xff]  ;;  %v694_v14 = vld [vmem:[#allocation5 + $0x300] sm:$0xff] }
 0x146   : > { %2121 = vmatpush1.bf16.msra.mxu0 %v2120_v7  ;;  %v587_v16 = vmax.f32 %v479_v18, 0.0  ;;  %v482_v21 = vpop.f32.mrb[4].mxu0  ;;  %v692_v7 = vld [vmem:[#allocation5 + $0x2f0] sm:$0xff]  ;;  %v2150_v13 = vpack.c.bf16 %v697_v10, %v695_v8  ;;  %v699_v18 = vld [vmem:[#allocation5 + $0x328] sm:$0xff]  ;;  %v722_v10 = vld [vmem:[#allocation5 + $0x3e0] sm:$0xff] }
 0x147   : > { %2123 = vmatprep.subr.bf16.mxu0 %v2122_v11  ;;  %v483_v25 = vadd.f32 %v482_v21, %v387_v60  ;;  %v484_v26 = vpop.f32.mrb[5].mxu0  ;;  %v2859_v11 = vrot.slane %v2846_v58, %v398_v4  ;;  %v2148_v12 = vpack.c.bf16 %v692_v7, %v690_v6  ;;  %v2176_v6 = vpack.c.bf16 %v720_v3, %v718_v0 }
 0x148   : > { %v485_v29 = vadd.f32 %v484_v26, %v391_v61  ;;  %808 = vmatprep.mubr.f32.mxu0 %v587_v16  ;;  %v2152_v16 = vpack.c.bf16 %v696_v15, %v694_v14  ;;  %v395_v7 = vrot.slane %v2846_v58, %v394_v62 }
 0x149   : > { %v590_v30 = vmax.f32 %v483_v25, 0.0  ;;  %809 = vmatmul.mubr.f32.gmra.mrb[18].mxu0 %v586_v19  ;;  %v701_v19 = vld [vmem:[#allocation5 + $0x338] sm:$0xff]  ;;  %v700_v25 = vld [vmem:[#allocation5 + $0x330] sm:$0xff] }
 0x14a   : > { %2125 = vmatpush1.bf16.msra.mxu0 %v2124_v20  ;;  %v591_v32 = vmax.f32 %v485_v29, 0.0  ;;  %v488_v33 = vpop.f32.mrb[6].mxu0  ;;  %v2154_v23 = vpack.c.bf16 %v701_v19, %v699_v18  ;;  %v2156_v29 = vpack.c.bf16 %v700_v25, %v698_v24 }
 0x14b   : > { %2127 = vmatprep.subr.bf16.mxu0 %v2126_v22  ;;  %v489_v37 = vadd.f32 %v488_v33, %v387_v60  ;;  %v490_v38 = vpop.f32.mrb[7].mxu0  ;;  %v689_v60 = vld [vmem:[#allocation5 + $0x2d8] sm:$0xff]  ;;  %v704_v33 = vld [vmem:[#allocation5 + $0x350] sm:$0xff] }
 0x14c   : > { %v491_v41 = vadd.f32 %v490_v38, %v391_v61  ;;  %814 = vmatprep.mubr.f32.mxu0 %v591_v32  ;;  %v2140_v61 = vpack.c.bf16 %v684_v53, %v682_v52  ;;  %v2142_v57 = vpack.c.bf16 %v689_v60, %v687_v54  ;;  %v702_v32 = vld [vmem:[#allocation5 + $0x340] sm:$0xff]  ;;  %v716_v54 = vld [vmem:[#allocation5 + $0x3b0] sm:$0xff]  ;;  %v719_v60 = vld [vmem:[#allocation5 + $0x3c8] sm:$0xff] }
 0x14d   : > { %v594_v42 = vmax.f32 %v489_v37, 0.0  ;;  %815 = vmatmul.mubr.f32.gmra.mrb[20].mxu0 %v590_v30  ;;  %v2160_v37 = vpack.c.bf16 %v704_v33, %v702_v32  ;;  %v714_v53 = vld [vmem:[#allocation5 + $0x3a0] sm:$0xff]  ;;  %v1066_v32 = vld [vmem:[#allocation3 + $0x28] sm:$0xff] }
 0x14e   : > { %2129 = vmatpush1.bf16.msra.mxu0 %v2128_v31  ;;  %v595_v44 = vmax.f32 %v491_v41, 0.0  ;;  %v2158_v31 = vpack.c.bf16 %v705_v28, %v703_v27  ;;  %v708_v41 = vld [vmem:[#allocation5 + $0x370] sm:$0xff] }
 0x14f   : > { %2131 = vmatprep.subr.bf16.mxu0 %v2130_v34  ;;  %v955_v27 = vld [vmem:[%s3082_s5 + $0xf8] sm:$0xff] }
 0x150   : > { %820 = vmatprep.mubr.f32.mxu0 %v595_v44  ;;  %v713_v44 = vld [vmem:[#allocation5 + $0x398] sm:$0xff] }
 0x151   : > { %821 = vmatmul.mubr.f32.gmra.mrb[22].mxu0 %v594_v42 }
 0x152   : > { %2133 = vmatpush1.bf16.msra.mxu0 %v2132_v43  ;;  %v711_v43 = vld [vmem:[#allocation5 + $0x388] sm:$0xff] }
 0x153   : > { %2135 = vmatprep.subr.bf16.mxu0 %v2134_v45  ;;  %v2164_v45 = vpack.c.bf16 %v708_v41, %v706_v40  ;;  %v2166_v46 = vpack.c.bf16 %v713_v44, %v711_v43  ;;  %v1065_v43 = vld [vmem:[#allocation3 + $0x20] sm:$0xff] }
 0x156   : > { %2137 = vmatpush1.bf16.msra.mxu0 %v2136_v50  ;;  %v717_v50 = vld [vmem:[#allocation5 + $0x3b8] sm:$0xff] }
 0x157   : > { %2139 = vmatprep.subr.bf16.mxu0 %v2138_v51  ;;  %v2168_v51 = vpack.c.bf16 %v712_v48, %v710_v47  ;;  %v2170_v52 = vpack.c.bf16 %v717_v50, %v715_v49 }
 0x15a   : > { %2141 = vmatpush1.bf16.msra.mxu0 %v2140_v61  ;;  %v721_v61 = vld [vmem:[#allocation5 + $0x3d8] sm:$0xff] }
 0x15b   : > { %2143 = vmatprep.subr.bf16.mxu0 %v2142_v57  ;;  %v2172_v57 = vpack.c.bf16 %v716_v54, %v714_v53  ;;  %v2174_v63 = vpack.c.bf16 %v721_v61, %v719_v60  ;;  %v1069_v54 = vld [vmem:[#allocation3 + $0x40] sm:$0xff] }
 0x15c   : > { %v1073_v60 = vld [vmem:[#allocation3 + $0x60] sm:$0xff] }
 0x15e   : > { %2145 = vmatpush1.bf16.msra.mxu0 %v2144_v2  ;;  %v2861_v9 = vpop.f32.mrb[8].mxu0  ;;  %v723_v2 = vld [vmem:[#allocation5 + $0x3e8] sm:$0xff] }
 0x15f   : > { %2147 = vmatprep.subr.bf16.mxu0 %v2146_v5  ;;  %v561_v17 = vpop.f32.mrb[9].mxu0  ;;  %v725_v5 = vld [vmem:[#allocation5 + $0x3f8] sm:$0xff]  ;;  %v560_v15 = vadd.f32 %v2861_v9, %v395_v7 }
 0x160   : > { %v562_v20 = vadd.f32 %v561_v17, %v2859_v11  ;;  %v2178_v8 = vpack.c.bf16 %v725_v5, %v723_v2  ;;  %v2220_v2 = vpack.c.bf16 %v1073_v60, %v1069_v54  ;;  %v1067_v54 = vld [vmem:[#allocation3 + $0x30] sm:$0xff]  ;;  %v1072_v60 = vld [vmem:[#allocation3 + $0x58] sm:$0xff] }
 0x162   : > { %2149 = vmatpush1.bf16.msra.mxu0 %v2148_v12  ;;  %v585_v21 = vmax.f32 %v562_v20, 0.0  ;;  %v2864_v22 = vpop.f32.mrb[10].mxu0  ;;  %v724_v12 = vld [vmem:[#allocation5 + $0x3f0] sm:$0xff]  ;;  %v584_v20 = vmax.f32 %v560_v15, 0.0  ;;  %v1090_v15 = vld [vmem:[#allocation3 + $0xe8] sm:$0xff] }
 0x163   : > { %2151 = vmatprep.subr.bf16.mxu0 %v2150_v13  ;;  %v567_v26 = vpop.f32.mrb[11].mxu0  ;;  %v2180_v13 = vpack.c.bf16 %v724_v12, %v722_v10  ;;  %v566_v17 = vadd.f32 %v2864_v22, %v395_v7  ;;  %v954_v22 = vld [vmem:[%s3082_s5 + $0xf0] sm:$0xff]  ;;  %v1077_v10 = vld [vmem:[#allocation3 + $0x80] sm:$0xff] }
 0x164   : > { %891 = vmatprep.mubr.f32.mxu0 %v585_v21  ;;  %v568_v14 = vadd.f32 %v567_v26, %v2859_v11  ;;  %v2210_v28 = vpack.c.bf16 %v955_v27, %v954_v22  ;;  %v1081_v12 = vld [vmem:[#allocation3 + $0xa0] sm:$0xff] }
 0x166   : > { %2153 = vmatpush1.bf16.msra.mxu0 %v2152_v16  ;;  %v571_v30 = vpop.f32.mrb[12].mxu0  ;;  %v589_v18 = vmax.f32 %v568_v14, 0.0  ;;  %v588_v16 = vmax.f32 %v566_v17, 0.0  ;;  %2211 = vmatprep.subr.bf16.mxu1 %v2210_v28  ;;  %v1086_v14 = vld [vmem:[#allocation3 + $0xc8] sm:$0xff] }
 0x167   : > { %2155 = vmatprep.subr.bf16.mxu0 %v2154_v23  ;;  %v573_v34 = vpop.f32.mrb[13].mxu0  ;;  %v572_v58 = vadd.f32 %v571_v30, %v395_v7 }
 0x168   : > { %v574_v19 = vadd.f32 %v573_v34, %v2859_v11  ;;  %v2585_v34 = vmov 0  }
 0x169   : > { %v592_v24 = vmax.f32 %v572_v58, 0.0  ;;  %2505 = vset.pattern.permute.xlu0 %v2585_v34 }
 0x16a   : > { %2157 = vmatpush1.bf16.msra.mxu0 %v2156_v29  ;;  %v577_v38 = vpop.f32.mrb[14].mxu0  ;;  %v593_v21 = vmax.f32 %v574_v19, 0.0  ;;  %v939_v29 = vld [vmem:[%s3082_s5 + $0x78] sm:$0xff]  ;;  %963 = vperm.xlu0 %2505, %v1890_v35   ;;  %v2224_v19 = vpack.c.bf16 %v1081_v12, %v1077_v10 }
 0x16b   : > { %2159 = vmatprep.subr.bf16.mxu0 %v2158_v31  ;;  %v579_v42 = vpop.f32.mrb[15].mxu0  ;;  %v578_v25 = vadd.f32 %v577_v38, %v395_v7  ;;  %v1062_v31 = vld [vmem:[#allocation3 + $0x8] sm:$0xff]  ;;  %v735_v38 = vrot.slane %v726_v36, %v2849_v59  ;;  %v1079_v12 = vld [vmem:[#allocation3 + $0x90] sm:$0xff] }
 0x16c   : > { %v580_v23 = vadd.f32 %v579_v42, %v2859_v11  ;;  %v938_v11 = vld [vmem:[%s3082_s5 + $0x70] sm:$0xff]  ;;  %v2214_v33 = vpack.c.bf16 %v1066_v32, %v1062_v31  ;;  %v1061_v42 = vld [vmem:[#allocation3] sm:$0xff] }
 0x16d   : > { %v596_v9 = vmax.f32 %v578_v25, 0.0  ;;  %v2212_v30 = vpack.c.bf16 %v939_v29, %v938_v11  ;;  %v2216_v49 = vpack.c.bf16 %v1065_v43, %v1061_v42  ;;  %v1093_v29 = vld [vmem:[#allocation3 + $0x100] sm:$0xff]  ;;  %v1102_v31 = vld [vmem:[#allocation3 + $0x148] sm:$0xff] }
 0x16e   : > { %2161 = vmatpush1.bf16.msra.mxu0 %v2160_v37  ;;  %v597_v26 = vmax.f32 %v580_v23, 0.0  ;;  %1706 = vperm.xlu0 %2505, %v1890_v35   ;;  %v731_v37 = vrot.slane %v726_v36, %v2841_v56  ;;  %v1085_v23 = vld [vmem:[#allocation3 + $0xc0] sm:$0xff]  ;;  %v1106_v32 = vld [vmem:[#allocation3 + $0x168] sm:$0xff] }
 0x16f   : > { %2163 = vmatprep.subr.bf16.mxu0 %v2162_v39  ;;  %2213 = vmatpush3.bf16.msra.mxu1 %v2212_v30  ;;  %v1097_v30 = vld [vmem:[#allocation3 + $0x120] sm:$0xff]  ;;  %v2234_v34 = vpack.c.bf16 %v1106_v32, %v1102_v31  ;;  %v1118_v43 = vld [vmem:[#allocation3 + $0x1c8] sm:$0xff]  ;;  %v1112_v31 = vld [vmem:[#allocation3 + $0x198] sm:$0xff] }
 0x170   : > { %2215 = vmatprep.subr.bf16.mxu1 %v2214_v33  ;;  %v2232_v33 = vpack.c.bf16 %v1097_v30, %v1093_v29  ;;  %v1101_v35 = vld [vmem:[#allocation3 + $0x140] sm:$0xff]  ;;  %v1103_v29 = vld [vmem:[#allocation3 + $0x150] sm:$0xff]  ;;  %v1116_v32 = vld [vmem:[#allocation3 + $0x1b8] sm:$0xff] }
 0x171   : > { %v1105_v36 = vld [vmem:[#allocation3 + $0x160] sm:$0xff]  ;;  %v1107_v30 = vld [vmem:[#allocation3 + $0x170] sm:$0xff] }
 0x172   : > { %2165 = vmatpush1.bf16.msra.mxu0 %v2164_v45  ;;  %v1070_v45 = vld [vmem:[#allocation3 + $0x48] sm:$0xff]  ;;  %v1113_v42 = vld [vmem:[#allocation3 + $0x1a0] sm:$0xff] }
 0x173   : > { %2167 = vmatprep.subr.bf16.mxu0 %v2166_v46  ;;  %v1074_v46 = vld [vmem:[#allocation3 + $0x68] sm:$0xff] }
 0x174   : > { %v2218_v53 = vpack.c.bf16 %v1074_v46, %v1070_v45 }
 0x176   : > { %2169 = vmatpush1.bf16.msra.mxu0 %v2168_v51 }
 0x177   : > { %2171 = vmatprep.subr.bf16.mxu0 %v2170_v52 }
 0x17a   : > { %2173 = vmatpush1.bf16.msra.mxu0 %v2172_v57  ;;  %v1078_v57 = vld [vmem:[#allocation3 + $0x88] sm:$0xff] }
 0x17b   : > { %2175 = vmatprep.subr.bf16.mxu0 %v2174_v63  ;;  %v1082_v63 = vld [vmem:[#allocation3 + $0xa8] sm:$0xff] }
 0x17e   : > { %2177 = vmatpush1.bf16.msra.mxu0 %v2176_v6 }
 0x17f   : > { %2179 = vmatprep.subr.bf16.mxu0 %v2178_v8  ;;  %v2222_v8 = vpack.c.bf16 %v1082_v63, %v1078_v57  ;;  %v2894_v57 = vld [vmem:[%s2725_s10 + $0x20] sm:$0xff] }
 0x182   : > { %2181 = vmatpush1.bf16.msra.mxu0 %v2180_v13 }
 0x185   : > { %892 = vmatmul.mubr.f32.vlgmr.msra.gmra.mrb[16].mxu0 %v584_v20 }
 0x186   : > { %897 = vmatprep.mubr.f32.mxu0 %v589_v18 }
 0x189   : > { %898 = vmatmul.mubr.f32.gmra.mrb[18].mxu0 %v588_v16 }
 0x18a   : > { %903 = vmatprep.mubr.f32.mxu0 %v593_v21  ;;  %v2226_v21 = vpack.c.bf16 %v1090_v15, %v1086_v14  ;;  %v1088_v14 = vld [vmem:[#allocation3 + $0xd8] sm:$0xff] }
 0x18b   : > { %v1092_v15 = vld [vmem:[#allocation3 + $0xf8] sm:$0xff] }
 0x18d   : > { %904 = vmatmul.mubr.f32.gmra.mrb[20].mxu0 %v592_v24  ;;  %v1089_v24 = vld [vmem:[#allocation3 + $0xe0] sm:$0xff] }
 0x18e   : > { %909 = vmatprep.mubr.f32.mxu0 %v597_v26  ;;  %v1094_v26 = vld [vmem:[#allocation3 + $0x108] sm:$0xff]  ;;  %v2228_v27 = vpack.c.bf16 %v1089_v24, %v1085_v23  ;;  %v2909_v24 = vld [vmem:[%s2725_s10 + $0x38] sm:$0xff] }
 0x191   : > { %910 = vmatmul.mubr.f32.gmra.mrb[22].mxu0 %v596_v9  ;;  %v1098_v9 = vld [vmem:[#allocation3 + $0x128] sm:$0xff] }
 0x192   : > { %v2230_v11 = vpack.c.bf16 %v1098_v9, %v1094_v26  ;;  %v1095_v26 = vld [vmem:[#allocation3 + $0x110] sm:$0xff] }
 0x193   : > { %v1099_v9 = vld [vmem:[#allocation3 + $0x130] sm:$0xff] }
 0x258   : > { %v893_v39 = vpop.f32.mrb[16].mxu0 }
 0x259   : > { %v2438_v40 = vadd.f32 %v893_v39, %v731_v37  ;;  %v895_v41 = vpop.f32.mrb[17].mxu0  ;;  %v2236_v39 = vpack.c.bf16 %v1105_v36, %v1101_v35  ;;  %v1111_v35 = vld [vmem:[#allocation3 + $0x190] sm:$0xff] }
 0x25a   : > { %v2439_v44 = vadd.f32 %v895_v41, %v735_v38  ;;  %v1109_v41 = vld [vmem:[#allocation3 + $0x180] sm:$0xff]  ;;  %v1115_v36 = vld [vmem:[#allocation3 + $0x1b0] sm:$0xff] }
 0x25b   : > { %v916_v50 = vmax.f32 %v2438_v40, 0.0  ;;  %v2240_v45 = vpack.c.bf16 %v1113_v42, %v1109_v41  ;;  %v1119_v41 = vld [vmem:[#allocation3 + $0x1d0] sm:$0xff] }
 0x25c   : > { %v899_v47 = vpop.f32.mrb[18].mxu0  ;;  %v917_v48 = vmax.f32 %v2439_v44, 0.0  ;;  %v1122_v44 = vld [vmem:[#allocation3 + $0x1e8] sm:$0xff]  ;;  %v1123_v42 = vld [vmem:[#allocation3 + $0x1f0] sm:$0xff] }
 0x25d   : > { %v2440_v51 = vadd.f32 %v899_v47, %v731_v37  ;;  %v901_v52 = vpop.f32.mrb[19].mxu0  ;;  %v2242_v46 = vpack.c.bf16 %v1122_v44, %v1118_v43  ;;  %v1117_v47 = vld [vmem:[#allocation3 + $0x1c0] sm:$0xff]  ;;  %v1342_v43 = vld [vmem:[#allocation5 + $0x8] sm:$0xff]  ;;  %v1344_v44 = vld [vmem:[#allocation5 + $0x18] sm:$0xff] }
 0x25e   : > { %v2441_v61 = vadd.f32 %v901_v52, %v735_v38  ;;  %1030 = vmatprep.mubr.f32.mxu1 %v917_v48  ;;  %v1121_v48 = vld [vmem:[#allocation3 + $0x1e0] sm:$0xff] }
 0x25f   : > { %1031 = vmatmul.mubr.f32.vlgmr.msra.gmra.mrb[0].mxu1 %v916_v50  ;;  %v918_v5 = vmax.f32 %v2440_v51, 0.0  ;;  %v1068_v50 = vld [vmem:[#allocation3 + $0x38] sm:$0xff]  ;;  %v2244_v51 = vpack.c.bf16 %v1121_v48, %v1117_v47  ;;  %v1341_v47 = vld [vmem:[#allocation5] sm:$0xff]  ;;  %v1343_v48 = vld [vmem:[#allocation5 + $0x10] sm:$0xff] }
 0x260   : > { %v919_v0 = vmax.f32 %v2441_v61, 0.0  ;;  %2217 = vmatpush1.bf16.msra.mxu1 %v2216_v49  ;;  %v905_v3 = vpop.f32.mrb[20].mxu0  ;;  %v1064_v49 = vld [vmem:[#allocation3 + $0x18] sm:$0xff] }
 0x261   : > { %v2442_v6 = vadd.f32 %v905_v3, %v731_v37  ;;  %v907_v7 = vpop.f32.mrb[21].mxu0  ;;  %2219 = vmatprep.subr.bf16.mxu1 %v2218_v53  ;;  %v2246_v52 = vpack.c.bf16 %v1068_v50, %v1064_v49  ;;  %v1063_v53 = vld [vmem:[#allocation3 + $0x10] sm:$0xff]  ;;  %v1076_v61 = vld [vmem:[#allocation3 + $0x78] sm:$0xff]  ;;  %v1346_v49 = vld [vmem:[#allocation5 + $0x28] sm:$0xff] }
 0x262   : > { %v2443_v13 = vadd.f32 %v907_v7, %v735_v38  ;;  %1035 = vmatprep.mubr.f32.mxu1 %v919_v0  ;;  %v2248_v63 = vpack.c.bf16 %v1067_v54, %v1063_v53  ;;  %v2250_v0 = vpack.c.bf16 %v1076_v61, %v1072_v60  ;;  %v1071_v3 = vld [vmem:[#allocation3 + $0x50] sm:$0xff]  ;;  %v1348_v50 = vld [vmem:[#allocation5 + $0x38] sm:$0xff]  ;;  %v1345_v53 = vld [vmem:[#allocation5 + $0x20] sm:$0xff] }
 0x263   : > { %1036 = vmatmul.mubr.f32.gmra.mrb[2].mxu1 %v918_v5  ;;  %v920_v20 = vmax.f32 %v2442_v6, 0.0  ;;  %v1080_v5 = vld [vmem:[#allocation3 + $0x98] sm:$0xff]  ;;  %v1347_v54 = vld [vmem:[#allocation5 + $0x30] sm:$0xff]  ;;  %v1350_v60 = vld [vmem:[#allocation5 + $0x48] sm:$0xff] }
 0x264   : > { %v921_v17 = vmax.f32 %v2443_v13, 0.0  ;;  %2221 = vmatpush1.bf16.msra.mxu1 %v2220_v2  ;;  %v911_v18 = vpop.f32.mrb[22].mxu0  ;;  %v1075_v2 = vld [vmem:[#allocation3 + $0x70] sm:$0xff]  ;;  %v1084_v6 = vld [vmem:[#allocation3 + $0xb8] sm:$0xff] }
 0x265   : > { %v2444_v16 = vadd.f32 %v911_v18, %v731_v37  ;;  %v913_v58 = vpop.f32.mrb[23].mxu0  ;;  %2223 = vmatprep.subr.bf16.mxu1 %v2222_v8  ;;  %v1110_v37 = vld [vmem:[#allocation3 + $0x188] sm:$0xff]  ;;  %v2252_v7 = vpack.c.bf16 %v1075_v2, %v1071_v3  ;;  %v2254_v10 = vpack.c.bf16 %v1084_v6, %v1080_v5  ;;  %v1083_v13 = vld [vmem:[#allocation3 + $0xb0] sm:$0xff]  ;;  %v1352_v61 = vld [vmem:[#allocation5 + $0x58] sm:$0xff] }
 0x266   : > { %v2445_v25 = vadd.f32 %v913_v58, %v735_v38  ;;  %1040 = vmatprep.mubr.f32.mxu1 %v921_v17  ;;  %v1114_v38 = vld [vmem:[#allocation3 + $0x1a8] sm:$0xff]  ;;  %v2256_v17 = vpack.c.bf16 %v1083_v13, %v1079_v12  ;;  %v1096_v58 = vld [vmem:[#allocation3 + $0x118] sm:$0xff]  ;;  %v1349_v3 = vld [vmem:[#allocation5 + $0x40] sm:$0xff] }
 0x267   : > { %1041 = vmatmul.mubr.f32.gmra.mrb[4].mxu1 %v920_v20  ;;  %v922_v28 = vmax.f32 %v2444_v16, 0.0  ;;  %v2238_v40 = vpack.c.bf16 %v1114_v38, %v1110_v37  ;;  %v2899_v8 = vld [vmem:[%s2725_s10 + $0x28] sm:$0xff]  ;;  %v2904_v18 = vld [vmem:[%s2725_s10 + $0x30] sm:$0xff]  ;;  %v1120_v37 = vld [vmem:[#allocation3 + $0x1d8] sm:$0xff] }
 0x268   : > { %v923_v22 = vmax.f32 %v2445_v25, 0.0  ;;  %2225 = vmatpush1.bf16.msra.mxu1 %v2224_v19  ;;  %v2258_v19 = vpack.c.bf16 %v1092_v15, %v1088_v14  ;;  %v1087_v20 = vld [vmem:[#allocation3 + $0xd0] sm:$0xff]  ;;  %v1124_v38 = vld [vmem:[#allocation3 + $0x1f8] sm:$0xff]  ;;  %v1354_v5 = vld [vmem:[#allocation5 + $0x68] sm:$0xff] }
 0x269   : > { %2227 = vmatprep.subr.bf16.mxu1 %v2226_v21  ;;  %v1091_v16 = vld [vmem:[#allocation3 + $0xf0] sm:$0xff]  ;;  %v1100_v21 = vld [vmem:[#allocation3 + $0x138] sm:$0xff]  ;;  %v1353_v12 = vld [vmem:[#allocation5 + $0x60] sm:$0xff] }
 0x26a   : > { %1045 = vmatprep.mubr.f32.mxu1 %v923_v22  ;;  %v2260_v23 = vpack.c.bf16 %v1091_v16, %v1087_v20  ;;  %v2262_v25 = vpack.c.bf16 %v1100_v21, %v1096_v58  ;;  %v1104_v22 = vld [vmem:[#allocation3 + $0x158] sm:$0xff]  ;;  %v1351_v2 = vld [vmem:[#allocation5 + $0x50] sm:$0xff]  ;;  %v1358_v13 = vld [vmem:[#allocation5 + $0x88] sm:$0xff] }
 0x26b   : > { %1046 = vmatmul.mubr.f32.gmra.mrb[6].mxu1 %v922_v28  ;;  %v2264_v28 = vpack.c.bf16 %v1099_v9, %v1095_v26  ;;  %v1356_v6 = vld [vmem:[#allocation5 + $0x78] sm:$0xff]  ;;  %v1362_v20 = vld [vmem:[#allocation5 + $0xa8] sm:$0xff] }
 0x26c   : > { %2229 = vmatpush1.bf16.msra.mxu1 %v2228_v27  ;;  %1211 = vmatprep.mubr.f32.mxu1 %v2584_v1  ;;  %v1108_v27 = vld [vmem:[#allocation3 + $0x178] sm:$0xff]  ;;  %v1366_v26 = vld [vmem:[#allocation5 + $0xc8] sm:$0xff] }
 0x26d   : > { %2231 = vmatprep.subr.bf16.mxu1 %v2230_v11  ;;  %v2266_v11 = vpack.c.bf16 %v1108_v27, %v1104_v22  ;;  %v1360_v14 = vld [vmem:[#allocation5 + $0x98] sm:$0xff]  ;;  %v1365_v22 = vld [vmem:[#allocation5 + $0xc0] sm:$0xff]  ;;  %v1367_v27 = vld [vmem:[#allocation5 + $0xd0] sm:$0xff] }
 0x26e   : > { %v1364_v16 = vld [vmem:[#allocation5 + $0xb8] sm:$0xff] }
 0x26f   : > { %v2298_v21 = vpack.c.bf16 %v1364_v16, %v1362_v20  ;;  %v1399_v20 = vld [vmem:[#allocation5 + $0x1d0] sm:$0xff]  ;;  %v1402_v16 = vld [vmem:[#allocation5 + $0x1e8] sm:$0xff] }
 0x270   : > { %2233 = vmatpush1.bf16.msra.mxu1 %v2232_v33  ;;  %v2268_v33 = vpack.c.bf16 %v1107_v30, %v1103_v29  ;;  %v2304_v29 = vpack.c.bf16 %v1367_v27, %v1365_v22  ;;  %v1369_v30 = vld [vmem:[#allocation5 + $0xe0] sm:$0xff] }
 0x271   : > { %2235 = vmatprep.subr.bf16.mxu1 %v2234_v34  ;;  %v2270_v34 = vpack.c.bf16 %v1116_v32, %v1112_v31  ;;  %v1371_v31 = vld [vmem:[#allocation5 + $0xf0] sm:$0xff]  ;;  %v1374_v32 = vld [vmem:[#allocation5 + $0x108] sm:$0xff]  ;;  %v1683_v27 = vld [vmem:[%s3082_s5 + $0x80] sm:$0xff] }
 0x274   : > { %2237 = vmatpush1.bf16.msra.mxu1 %v2236_v39  ;;  %v2272_v39 = vpack.c.bf16 %v1115_v36, %v1111_v35  ;;  %v1373_v36 = vld [vmem:[#allocation5 + $0x100] sm:$0xff] }
 0x275   : > { %2239 = vmatprep.subr.bf16.mxu1 %v2238_v40  ;;  %v2274_v40 = vpack.c.bf16 %v1124_v38, %v1120_v37  ;;  %v1375_v37 = vld [vmem:[#allocation5 + $0x110] sm:$0xff]  ;;  %v1378_v38 = vld [vmem:[#allocation5 + $0x128] sm:$0xff] }
 0x278   : > { %2241 = vmatpush1.bf16.msra.mxu1 %v2240_v45  ;;  %v2276_v45 = vpack.c.bf16 %v1123_v42, %v1119_v41  ;;  %v1377_v42 = vld [vmem:[#allocation5 + $0x120] sm:$0xff] }
 0x279   : > { %2243 = vmatprep.subr.bf16.mxu1 %v2242_v46  ;;  %v2278_v46 = vpack.c.bf16 %v1344_v44, %v1342_v43  ;;  %v1379_v43 = vld [vmem:[#allocation5 + $0x130] sm:$0xff]  ;;  %v1382_v44 = vld [vmem:[#allocation5 + $0x148] sm:$0xff] }
 0x27c   : > { %2245 = vmatpush1.bf16.msra.mxu1 %v2244_v51  ;;  %v2280_v51 = vpack.c.bf16 %v1343_v48, %v1341_v47  ;;  %v1381_v48 = vld [vmem:[#allocation5 + $0x140] sm:$0xff] }
 0x27d   : > { %2247 = vmatprep.subr.bf16.mxu1 %v2246_v52  ;;  %v2282_v52 = vpack.c.bf16 %v1348_v50, %v1346_v49  ;;  %v1383_v49 = vld [vmem:[#allocation5 + $0x150] sm:$0xff]  ;;  %v1386_v50 = vld [vmem:[#allocation5 + $0x168] sm:$0xff] }
 0x27f   : > { %1212 = vmatmul.mubr.f32.vlgmr.msra.gmra.mrb[8].mxu1 %v2894_v57 }
 0x280   : > { %2249 = vmatpush1.bf16.msra.mxu1 %v2248_v63  ;;  %1217 = vmatprep.mubr.f32.mxu1 %v2584_v1  ;;  %v2284_v63 = vpack.c.bf16 %v1347_v54, %v1345_v53  ;;  %v1385_v54 = vld [vmem:[#allocation5 + $0x160] sm:$0xff] }
 0x281   : > { %2251 = vmatprep.subr.bf16.mxu1 %v2250_v0  ;;  %v2286_v0 = vpack.c.bf16 %v1352_v61, %v1350_v60  ;;  %v1387_v60 = vld [vmem:[#allocation5 + $0x170] sm:$0xff]  ;;  %v1390_v61 = vld [vmem:[#allocation5 + $0x188] sm:$0xff] }
 0x283   : > { %1218 = vmatmul.mubr.f32.gmra.mrb[10].mxu1 %v2899_v8 }
 0x284   : > { %2253 = vmatpush1.bf16.msra.mxu1 %v2252_v7  ;;  %1223 = vmatprep.mubr.f32.mxu1 %v2584_v1  ;;  %v2288_v7 = vpack.c.bf16 %v1351_v2, %v1349_v3  ;;  %v1389_v2 = vld [vmem:[#allocation5 + $0x180] sm:$0xff] }
 0x285   : > { %2255 = vmatprep.subr.bf16.mxu1 %v2254_v10  ;;  %v2290_v10 = vpack.c.bf16 %v1356_v6, %v1354_v5  ;;  %v1391_v5 = vld [vmem:[#allocation5 + $0x190] sm:$0xff]  ;;  %v1394_v6 = vld [vmem:[#allocation5 + $0x1a8] sm:$0xff] }
 0x287   : > { %1224 = vmatmul.mubr.f32.gmra.mrb[12].mxu1 %v2904_v18 }
 0x288   : > { %2257 = vmatpush1.bf16.msra.mxu1 %v2256_v17  ;;  %1229 = vmatprep.mubr.f32.mxu1 %v2584_v1  ;;  %v2294_v17 = vpack.c.bf16 %v1360_v14, %v1358_v13  ;;  %v1395_v13 = vld [vmem:[#allocation5 + $0x1b0] sm:$0xff]  ;;  %v1398_v14 = vld [vmem:[#allocation5 + $0x1c8] sm:$0xff] }
 0x289   : > { %2259 = vmatprep.subr.bf16.mxu1 %v2258_v19  ;;  %v1357_v19 = vld [vmem:[#allocation5 + $0x80] sm:$0xff] }
 0x28b   : > { %1230 = vmatmul.mubr.f32.gmra.mrb[14].mxu1 %v2909_v24 }
 0x28c   : > { %2261 = vmatpush1.bf16.msra.mxu1 %v2260_v23  ;;  %1300 = vmatprep.mubr.f32.mxu1 %v2584_v1  ;;  %v1361_v23 = vld [vmem:[#allocation5 + $0xa0] sm:$0xff] }
 0x28d   : > { %2263 = vmatprep.subr.bf16.mxu1 %v2262_v25  ;;  %v1363_v25 = vld [vmem:[#allocation5 + $0xb0] sm:$0xff] }
 0x290   : > { %2265 = vmatpush1.bf16.msra.mxu1 %v2264_v28  ;;  %v1370_v28 = vld [vmem:[#allocation5 + $0xe8] sm:$0xff] }
 0x291   : > { %2267 = vmatprep.subr.bf16.mxu1 %v2266_v11  ;;  %v1372_v11 = vld [vmem:[#allocation5 + $0xf8] sm:$0xff] }
 0x294   : > { %2269 = vmatpush1.bf16.msra.mxu1 %v2268_v33  ;;  %v1376_v33 = vld [vmem:[#allocation5 + $0x118] sm:$0xff] }
 0x295   : > { %2271 = vmatprep.subr.bf16.mxu1 %v2270_v34  ;;  %v2308_v34 = vpack.c.bf16 %v1371_v31, %v1369_v30  ;;  %v2310_v35 = vpack.c.bf16 %v1376_v33, %v1374_v32  ;;  %v1685_v30 = vld [vmem:[%s3082_s5 + $0x90] sm:$0xff]  ;;  %v1686_v31 = vld [vmem:[%s3082_s5 + $0x98] sm:$0xff] }
 0x296   : > { %v2410_v33 = vpack.c.bf16 %v1686_v31, %v1685_v30  ;;  %v1410_v31 = vld [vmem:[#allocation5 + $0x228] sm:$0xff] }
 0x298   : > { %2273 = vmatpush1.bf16.msra.mxu1 %v2272_v39  ;;  %v1380_v39 = vld [vmem:[#allocation5 + $0x138] sm:$0xff] }
 0x299   : > { %2275 = vmatprep.subr.bf16.mxu1 %v2274_v40  ;;  %v2312_v40 = vpack.c.bf16 %v1375_v37, %v1373_v36  ;;  %v2314_v41 = vpack.c.bf16 %v1380_v39, %v1378_v38  ;;  %v1687_v36 = vld [vmem:[%s3082_s5 + $0xa0] sm:$0xff]  ;;  %v1688_v37 = vld [vmem:[%s3082_s5 + $0xa8] sm:$0xff] }
 0x29a   : > { %v2414_v39 = vpack.c.bf16 %v1688_v37, %v1687_v36 }
 0x29c   : > { %2277 = vmatpush1.bf16.msra.mxu1 %v2276_v45  ;;  %v1384_v45 = vld [vmem:[#allocation5 + $0x158] sm:$0xff] }
 0x29d   : > { %2279 = vmatprep.subr.bf16.mxu1 %v2278_v46  ;;  %v2316_v46 = vpack.c.bf16 %v1379_v43, %v1377_v42  ;;  %v2318_v47 = vpack.c.bf16 %v1384_v45, %v1382_v44  ;;  %v1689_v42 = vld [vmem:[%s3082_s5 + $0xb0] sm:$0xff]  ;;  %v1690_v43 = vld [vmem:[%s3082_s5 + $0xb8] sm:$0xff] }
 0x29e   : > { %v2418_v45 = vpack.c.bf16 %v1690_v43, %v1689_v42  ;;  %v1414_v42 = vld [vmem:[#allocation5 + $0x248] sm:$0xff]  ;;  %v1416_v43 = vld [vmem:[#allocation5 + $0x258] sm:$0xff] }
 0x29f   : > { %1301 = vmatmul.mubr.f32.vlgmr.msra.gmra.mrb[16].mxu1 %v2894_v57  ;;  %v1355_v57 = vld [vmem:[#allocation5 + $0x70] sm:$0xff] }
 0x2a0   : > { %1306 = vmatprep.mubr.f32.mxu1 %v2584_v1  ;;  %2281 = vmatpush1.bf16.msra.mxu1 %v2280_v51  ;;  %v2292_v15 = vpack.c.bf16 %v1355_v57, %v1353_v12  ;;  %v1388_v51 = vld [vmem:[#allocation5 + $0x178] sm:$0xff]  ;;  %v1393_v57 = vld [vmem:[#allocation5 + $0x1a0] sm:$0xff] }
 0x2a1   : > { %2283 = vmatprep.subr.bf16.mxu1 %v2282_v52  ;;  %v2320_v52 = vpack.c.bf16 %v1383_v49, %v1381_v48  ;;  %v2322_v53 = vpack.c.bf16 %v1388_v51, %v1386_v50  ;;  %v1691_v48 = vld [vmem:[%s3082_s5 + $0xc0] sm:$0xff]  ;;  %v1692_v49 = vld [vmem:[%s3082_s5 + $0xc8] sm:$0xff] }
 0x2a3   : > { %1307 = vmatmul.mubr.f32.gmra.mrb[18].mxu1 %v2899_v8  ;;  %v1359_v8 = vld [vmem:[#allocation5 + $0x90] sm:$0xff] }
 0x2a4   : > { %1312 = vmatprep.mubr.f32.mxu1 %v2584_v1  ;;  %2285 = vmatpush1.bf16.msra.mxu1 %v2284_v63  ;;  %v2296_v58 = vpack.c.bf16 %v1359_v8, %v1357_v19  ;;  %v1392_v63 = vld [vmem:[#allocation5 + $0x198] sm:$0xff]  ;;  %v1397_v8 = vld [vmem:[#allocation5 + $0x1c0] sm:$0xff] }
 0x2a5   : > { %2287 = vmatprep.subr.bf16.mxu1 %v2286_v0  ;;  %v2324_v0 = vpack.c.bf16 %v1387_v60, %v1385_v54  ;;  %v2326_v3 = vpack.c.bf16 %v1392_v63, %v1390_v61  ;;  %v1676_v54 = vld [vmem:[%s3082_s5 + $0x48] sm:$0xff]  ;;  %v964_v61 = vpop.permute.xlu0 %963  ;;  %v1693_v63 = vld [vmem:[%s3082_s5 + $0xd0] sm:$0xff] }
 0x2a7   : > { %1313 = vmatmul.mubr.f32.gmra.mrb[20].mxu1 %v2904_v18  ;;  %v1368_v18 = vld [vmem:[#allocation5 + $0xd8] sm:$0xff] }
 0x2a8   : > { %1318 = vmatprep.mubr.f32.mxu1 %v2584_v1  ;;  %2289 = vmatpush1.bf16.msra.mxu1 %v2288_v7  ;;  %v2300_v1 = vpack.c.bf16 %v1363_v25, %v1361_v23  ;;  %v2302_v9 = vpack.c.bf16 %v1368_v18, %v1366_v26  ;;  %v1396_v7 = vld [vmem:[#allocation5 + $0x1b8] sm:$0xff]  ;;  %v1401_v25 = vld [vmem:[#allocation5 + $0x1e0] sm:$0xff]  ;;  %v1403_v26 = vld [vmem:[#allocation5 + $0x1f0] sm:$0xff] }
 0x2a9   : > { %2291 = vmatprep.subr.bf16.mxu1 %v2290_v10  ;;  %v2328_v10 = vpack.c.bf16 %v1391_v5, %v1389_v2  ;;  %v2330_v12 = vpack.c.bf16 %v1396_v7, %v1394_v6  ;;  %v1406_v18 = vld [vmem:[#allocation5 + $0x208] sm:$0xff] }
 0x2ab   : > { %1319 = vmatmul.mubr.f32.gmra.mrb[22].mxu1 %v2909_v24  ;;  %v2306_v24 = vpack.c.bf16 %v1372_v11, %v1370_v28  ;;  %v1684_v28 = vld [vmem:[%s3082_s5 + $0x88] sm:$0xff]  ;;  %v1667_v11 = vld [vmem:[%s3082_s5] sm:$0xff] }
 0x2ac   : > { %2293 = vmatpush1.bf16.msra.mxu1 %v2292_v15  ;;  %v1400_v15 = vld [vmem:[#allocation5 + $0x1d8] sm:$0xff] }
 0x2ad   : > { %2295 = vmatprep.subr.bf16.mxu1 %v2294_v17  ;;  %v2332_v17 = vpack.c.bf16 %v1395_v13, %v1393_v57  ;;  %v2334_v19 = vpack.c.bf16 %v1400_v15, %v1398_v14  ;;  %v1695_v13 = vld [vmem:[%s3082_s5 + $0xe0] sm:$0xff]  ;;  %v1696_v14 = vld [vmem:[%s3082_s5 + $0xe8] sm:$0xff] }
 0x2b0   : > { %2297 = vmatpush1.bf16.msra.mxu1 %v2296_v58  ;;  %v1404_v58 = vld [vmem:[#allocation5 + $0x1f8] sm:$0xff] }
 0x2b1   : > { %2299 = vmatprep.subr.bf16.mxu1 %v2298_v21  ;;  %v2336_v21 = vpack.c.bf16 %v1399_v20, %v1397_v8  ;;  %v2338_v23 = vpack.c.bf16 %v1404_v58, %v1402_v16  ;;  %v2430_v20 = vpack.c.bf16 %v1696_v14, %v1695_v13  ;;  %v1424_v13 = vld [vmem:[#allocation5 + $0x298] sm:$0xff] }
 0x2b4   : > { %2301 = vmatpush1.bf16.msra.mxu1 %v2300_v1  ;;  %v1408_v1 = vld [vmem:[#allocation5 + $0x218] sm:$0xff] }
 0x2b5   : > { %2303 = vmatprep.subr.bf16.mxu1 %v2302_v9  ;;  %v2340_v9 = vpack.c.bf16 %v1403_v26, %v1401_v25  ;;  %v2342_v22 = vpack.c.bf16 %v1408_v1, %v1406_v18  ;;  %v3016_v1 = vld [vmem:[%s3079_s2] sm:$0xf] }
 0x2b8   : > { %2305 = vmatpush1.bf16.msra.mxu1 %v2304_v29  ;;  %v2406_v29 = vpack.c.bf16 %v1684_v28, %v1683_v27 }
 0x2b9   : > { %2307 = vmatprep.subr.bf16.mxu1 %v2306_v24  ;;  %v1668_v24 = vld [vmem:[%s3082_s5 + $0x8] sm:$0xff] }
 0x2ba   : > { %v2408_v32 = vpack.c.bf16 %v1668_v24, %v1667_v11  ;;  %2407 = vmatprep.subr.bf16.mxu0 %v2406_v29  ;;  %v1405_v29 = vld [vmem:[#allocation5 + $0x200] sm:$0xff]  ;;  %v1407_v24 = vld [vmem:[#allocation5 + $0x210] sm:$0xff] }
 0x2bc   : > { %2309 = vmatpush1.bf16.msra.mxu1 %v2308_v34  ;;  %v1669_v34 = vld [vmem:[%s3082_s5 + $0x10] sm:$0xff]  ;;  %2409 = vmatpush3.bf16.msra.mxu0 %v2408_v32  ;;  %v1412_v32 = vld [vmem:[#allocation5 + $0x238] sm:$0xff] }
 0x2bd   : > { %2311 = vmatprep.subr.bf16.mxu1 %v2310_v35  ;;  %v1670_v35 = vld [vmem:[%s3082_s5 + $0x18] sm:$0xff]  ;;  %2411 = vmatprep.subr.bf16.mxu0 %v2410_v33  ;;  %v2346_v37 = vpack.c.bf16 %v1412_v32, %v1410_v31 }
 0x2be   : > { %v2412_v38 = vpack.c.bf16 %v1670_v35, %v1669_v34  ;;  %v2344_v34 = vpack.c.bf16 %v1407_v24, %v1405_v29  ;;  %v1431_v29 = vld [vmem:[#allocation5 + $0x2d0] sm:$0xff]  ;;  %v1434_v24 = vld [vmem:[#allocation5 + $0x2e8] sm:$0xff] }
 0x2c0   : > { %2313 = vmatpush1.bf16.msra.mxu1 %v2312_v40  ;;  %v1671_v40 = vld [vmem:[%s3082_s5 + $0x20] sm:$0xff]  ;;  %2413 = vmatpush3.bf16.msra.mxu0 %v2412_v38 }
 0x2c1   : > { %2315 = vmatprep.subr.bf16.mxu1 %v2314_v41  ;;  %v1672_v41 = vld [vmem:[%s3082_s5 + $0x28] sm:$0xff]  ;;  %2415 = vmatprep.subr.bf16.mxu0 %v2414_v39  ;;  %v1411_v39 = vld [vmem:[#allocation5 + $0x230] sm:$0xff] }
 0x2c2   : > { %v2416_v44 = vpack.c.bf16 %v1672_v41, %v1671_v40  ;;  %v1409_v38 = vld [vmem:[#allocation5 + $0x220] sm:$0xff] }
 0x2c4   : > { %2317 = vmatpush1.bf16.msra.mxu1 %v2316_v46  ;;  %v1673_v46 = vld [vmem:[%s3082_s5 + $0x30] sm:$0xff]  ;;  %2417 = vmatpush3.bf16.msra.mxu0 %v2416_v44 }
 0x2c5   : > { %2319 = vmatprep.subr.bf16.mxu1 %v2318_v47  ;;  %v1674_v47 = vld [vmem:[%s3082_s5 + $0x38] sm:$0xff]  ;;  %2419 = vmatprep.subr.bf16.mxu0 %v2418_v45 }
 0x2c6   : > { %v2420_v50 = vpack.c.bf16 %v1674_v47, %v1673_v46  ;;  %v2348_v46 = vpack.c.bf16 %v1411_v39, %v1409_v38 }
 0x2c8   : > { %2321 = vmatpush1.bf16.msra.mxu1 %v2320_v52  ;;  %v2422_v52 = vpack.c.bf16 %v1692_v49, %v1691_v48  ;;  %2421 = vmatpush3.bf16.msra.mxu0 %v2420_v50  ;;  %v2350_v49 = vpack.c.bf16 %v1416_v43, %v1414_v42  ;;  %v1413_v50 = vld [vmem:[#allocation5 + $0x240] sm:$0xff]  ;;  %v1439_v42 = vld [vmem:[#allocation5 + $0x310] sm:$0xff] }
 0x2c9   : > { %2323 = vmatprep.subr.bf16.mxu1 %v2322_v53  ;;  %v1675_v53 = vld [vmem:[%s3082_s5 + $0x40] sm:$0xff] }
 0x2ca   : > { %v2424_v2 = vpack.c.bf16 %v1676_v54, %v1675_v53  ;;  %2423 = vmatprep.subr.bf16.mxu0 %v2422_v52  ;;  %v1418_v54 = vld [vmem:[#allocation5 + $0x268] sm:$0xff] }
 0x2cc   : > { %2325 = vmatpush1.bf16.msra.mxu1 %v2324_v0  ;;  %v1694_v0 = vld [vmem:[%s3082_s5 + $0xd8] sm:$0xff]  ;;  %2425 = vmatpush3.bf16.msra.mxu0 %v2424_v2 }
 0x2cd   : > { %2327 = vmatprep.subr.bf16.mxu1 %v2326_v3  ;;  %v2426_v7 = vpack.c.bf16 %v1694_v0, %v1693_v63 }
 0x2cf   : > { %2427 = vmatprep.subr.bf16.mxu0 %v2426_v7  ;;  %v1419_v7 = vld [vmem:[#allocation5 + $0x270] sm:$0xff] }
 0x2d0   : > { %2329 = vmatpush1.bf16.msra.mxu1 %v2328_v10  ;;  %v1677_v10 = vld [vmem:[%s3082_s5 + $0x50] sm:$0xff] }
 0x2d1   : > { %2331 = vmatprep.subr.bf16.mxu1 %v2330_v12  ;;  %v1678_v12 = vld [vmem:[%s3082_s5 + $0x58] sm:$0xff] }
 0x2d4   : > { %2333 = vmatpush1.bf16.msra.mxu1 %v2332_v17  ;;  %v2428_v17 = vpack.c.bf16 %v1678_v12, %v1677_v10 }
 0x2d5   : > { %2335 = vmatprep.subr.bf16.mxu1 %v2334_v19 }
 0x2d6   : > { %2429 = vmatpush3.bf16.msra.mxu0 %v2428_v17 }
 0x2d7   : > { %2431 = vmatprep.subr.bf16.mxu0 %v2430_v20  ;;  %v1421_v20 = vld [vmem:[#allocation5 + $0x280] sm:$0xff] }
 0x2d8   : > { %2337 = vmatpush1.bf16.msra.mxu1 %v2336_v21 }
 0x2d9   : > { %2339 = vmatprep.subr.bf16.mxu1 %v2338_v23 }
 0x2dc   : > { %2341 = vmatpush1.bf16.msra.mxu1 %v2340_v9  ;;  %v1130_v9 = vrot.slane %v3016_v1, %v2841_v56 }
 0x2dd   : > { %2343 = vmatprep.subr.bf16.mxu1 %v2342_v22  ;;  %v1134_v22 = vrot.slane %v3016_v1, %v2849_v59 }
 0x332   : > { %v1934_v51 = vpop.f32.mrb[0].mxu1 }
 0x333   : > { %v1935_v60 = vpop.f32.mrb[1].mxu1 }
 0x334   : > { %v1936_v3 = vadd.f32 %v1935_v60, %v1934_v51  ;;  %v1415_v51 = vld [vmem:[#allocation5 + $0x250] sm:$0xff]  ;;  %v1420_v60 = vld [vmem:[#allocation5 + $0x278] sm:$0xff] }
 0x335   : > { %v2352_v0 = vpack.c.bf16 %v1415_v51, %v1413_v50  ;;  %v1441_v50 = vld [vmem:[#allocation5 + $0x320] sm:$0xff]  ;;  %v1443_v51 = vld [vmem:[#allocation5 + $0x330] sm:$0xff] }
 0x336   : > { %v1033_v5 = vadd.f32 %v1936_v3, %v964_v61  ;;  %v1937_v6 = vpop.f32.mrb[2].mxu1 }
 0x337   : > { %v1938_v57 = vpop.f32.mrb[3].mxu1 }
 0x338   : > { %1052 = vst.msk [vmem:[%s2991_s11] sm:$0xff] %vm1051_vm0, %v1033_v5  ;;  %v1939_v15 = vadd.f32 %v1938_v57, %v1937_v6  ;;  %v2354_v5 = vpack.c.bf16 %v1420_v60, %v1418_v54  ;;  %v1417_v6 = vld [vmem:[#allocation5 + $0x260] sm:$0xff]  ;;  %v1422_v57 = vld [vmem:[#allocation5 + $0x288] sm:$0xff]  ;;  %v1448_v54 = vld [vmem:[#allocation5 + $0x358] sm:$0xff]  ;;  %v2380_v60 = vpack.c.bf16 %v1443_v51, %v1441_v50 }
 0x339   : > { %v2356_v17 = vpack.c.bf16 %v1419_v7, %v1417_v6  ;;  %v1452_v6 = vld [vmem:[#allocation5 + $0x378] sm:$0xff]  ;;  %v1697_v50 = vld [vmem:[%s3082_s5 + $0xf0] sm:$0xff] }
 0x33a   : > { %v1038_v19 = vadd.f32 %v1939_v15, %v964_v61  ;;  %v1940_v8 = vpop.f32.mrb[4].mxu1  ;;  %v1698_v51 = vld [vmem:[%s3082_s5 + $0xf8] sm:$0xff] }
 0x33b   : > { %v1941_v16 = vpop.f32.mrb[5].mxu1 }
 0x33c   : > { %1053 = vst.msk [vmem:[%s2991_s11 + $0x8] sm:$0xff] %vm1051_vm0, %v1038_v19  ;;  %v1942_v58 = vadd.f32 %v1941_v16, %v1940_v8  ;;  %v2358_v8 = vpack.c.bf16 %v1424_v13, %v1422_v57  ;;  %v1423_v16 = vld [vmem:[#allocation5 + $0x290] sm:$0xff]  ;;  %v1449_v57 = vld [vmem:[#allocation5 + $0x360] sm:$0xff] }
 0x33d   : > { %v1451_v13 = vld [vmem:[#allocation5 + $0x370] sm:$0xff] }
 0x33e   : > { %v1043_v21 = vadd.f32 %v1942_v58, %v964_v61  ;;  %v1943_v23 = vpop.f32.mrb[6].mxu1  ;;  %v1426_v58 = vld [vmem:[#allocation5 + $0x2a8] sm:$0xff] }
 0x33f   : > { %v1944_v25 = vpop.f32.mrb[7].mxu1 }
 0x340   : > { %1054 = vst.msk [vmem:[%s2991_s11 + $0x10] sm:$0xff] %vm1051_vm0, %v1043_v21  ;;  %v1945_v26 = vadd.f32 %v1944_v25, %v1943_v23  ;;  %v1428_v21 = vld [vmem:[#allocation5 + $0x2b8] sm:$0xff]  ;;  %v2360_v23 = vpack.c.bf16 %v1423_v16, %v1421_v20  ;;  %v1453_v20 = vld [vmem:[#allocation5 + $0x380] sm:$0xff]  ;;  %v1455_v16 = vld [vmem:[#allocation5 + $0x390] sm:$0xff] }
 0x341   : > { %v2362_v25 = vpack.c.bf16 %v1428_v21, %v1426_v58  ;;  %v1458_v58 = vld [vmem:[#allocation5 + $0x3a8] sm:$0xff]  ;;  %v1460_v21 = vld [vmem:[#allocation5 + $0x3b8] sm:$0xff] }
 0x342   : > { %v1048_v18 = vadd.f32 %v1945_v26, %v964_v61  ;;  %v1425_v26 = vld [vmem:[#allocation5 + $0x2a0] sm:$0xff] }
 0x344   : > { %1055 = vst.msk [vmem:[%s2991_s11 + $0x18] sm:$0xff] %vm1051_vm0, %v1048_v18  ;;  %v1427_v18 = vld [vmem:[#allocation5 + $0x2b0] sm:$0xff] }
 0x352   : > { %v1213_v27 = vpop.f32.mrb[8].mxu1 }
 0x353   : > { %v1214_v28 = vadd.f32 %v1213_v27, %v1130_v9  ;;  %v1215_v11 = vpop.f32.mrb[9].mxu1  ;;  %v2364_v27 = vpack.c.bf16 %v1427_v18, %v1425_v26  ;;  %v1457_v26 = vld [vmem:[#allocation5 + $0x3a0] sm:$0xff]  ;;  %v1459_v18 = vld [vmem:[#allocation5 + $0x3b0] sm:$0xff] }
 0x354   : > { %v1216_v30 = vadd.f32 %v1215_v11, %v1134_v22  ;;  %v1429_v11 = vld [vmem:[#allocation5 + $0x2c0] sm:$0xff] }
 0x355   : > { %v1325_v36 = vmax.f32 %v1214_v28, 0.0  ;;  %v2368_v31 = vpack.c.bf16 %v1431_v29, %v1429_v11  ;;  %v1461_v11 = vld [vmem:[#allocation5 + $0x3c0] sm:$0xff]  ;;  %v1463_v29 = vld [vmem:[#allocation5 + $0x3d0] sm:$0xff] }
 0x356   : > { %v1326_v33 = vmax.f32 %v1216_v30, 0.0  ;;  %v1219_v35 = vpop.f32.mrb[10].mxu1  ;;  %v1436_v30 = vld [vmem:[#allocation5 + $0x2f8] sm:$0xff] }
 0x357   : > { %v1220_v40 = vadd.f32 %v1219_v35, %v1130_v9  ;;  %v1221_v41 = vpop.f32.mrb[11].mxu1  ;;  %v2370_v32 = vpack.c.bf16 %v1436_v30, %v1434_v24  ;;  %v1438_v35 = vld [vmem:[#allocation5 + $0x308] sm:$0xff]  ;;  %v1468_v30 = vld [vmem:[#allocation5 + $0x3f8] sm:$0xff] }
 0x358   : > { %1545 = vmatprep.mubr.f32.mxu1 %v1326_v33  ;;  %v1222_v44 = vadd.f32 %v1221_v41, %v1134_v22  ;;  %v1433_v33 = vld [vmem:[#allocation5 + $0x2e0] sm:$0xff]  ;;  %v1466_v24 = vld [vmem:[#allocation5 + $0x3e8] sm:$0xff] }
 0x359   : > { %1546 = vmatmul.mubr.f32.vlgmr.msra.gmra.mrb[24].mxu1 %v1325_v36  ;;  %v1329_v45 = vmax.f32 %v1220_v40, 0.0  ;;  %v1440_v36 = vld [vmem:[#allocation5 + $0x318] sm:$0xff]  ;;  %v1437_v41 = vld [vmem:[#allocation5 + $0x300] sm:$0xff] }
 0x35a   : > { %2345 = vmatpush1.bf16.msra.mxu1 %v2344_v34  ;;  %v1330_v47 = vmax.f32 %v1222_v44, 0.0  ;;  %v1225_v48 = vpop.f32.mrb[12].mxu1  ;;  %v1435_v34 = vld [vmem:[#allocation5 + $0x2f0] sm:$0xff]  ;;  %v2374_v40 = vpack.c.bf16 %v1440_v36, %v1438_v35  ;;  %v1442_v44 = vld [vmem:[#allocation5 + $0x328] sm:$0xff] }
 0x35b   : > { %2347 = vmatprep.subr.bf16.mxu1 %v2346_v37  ;;  %v1226_v52 = vadd.f32 %v1225_v48, %v1130_v9  ;;  %v1227_v53 = vpop.f32.mrb[13].mxu1  ;;  %v3025_v37 = vrot.slane %v3016_v1, %v398_v4  ;;  %v2372_v38 = vpack.c.bf16 %v1435_v34, %v1433_v33  ;;  %v2402_v33 = vpack.c.bf16 %v1468_v30, %v1466_v24  ;;  %v1465_v34 = vld [vmem:[#allocation5 + $0x3e0] sm:$0xff]  ;;  %v1467_v35 = vld [vmem:[#allocation5 + $0x3f0] sm:$0xff] }
 0x35c   : > { %v1228_v61 = vadd.f32 %v1227_v53, %v1134_v22  ;;  %1551 = vmatprep.mubr.f32.mxu1 %v1330_v47  ;;  %v2376_v47 = vpack.c.bf16 %v1439_v42, %v1437_v41  ;;  %v1446_v53 = vld [vmem:[#allocation5 + $0x348] sm:$0xff] }
 0x35d   : > { %v1333_v63 = vmax.f32 %v1226_v52, 0.0  ;;  %1552 = vmatmul.mubr.f32.gmra.mrb[26].mxu1 %v1329_v45  ;;  %v1444_v45 = vld [vmem:[#allocation5 + $0x338] sm:$0xff] }
 0x35e   : > { %2349 = vmatpush1.bf16.msra.mxu1 %v2348_v46  ;;  %v1334_v3 = vmax.f32 %v1228_v61, 0.0  ;;  %v1231_v2 = vpop.f32.mrb[14].mxu1  ;;  %v2378_v4 = vpack.c.bf16 %v1444_v45, %v1442_v44 }
 0x35f   : > { %2351 = vmatprep.subr.bf16.mxu1 %v2350_v49  ;;  %v1232_v10 = vadd.f32 %v1231_v2, %v1130_v9  ;;  %v1233_v12 = vpop.f32.mrb[15].mxu1  ;;  %v1430_v9 = vld [vmem:[#allocation5 + $0x2c8] sm:$0xff] }
 0x360   : > { %v1234_v14 = vadd.f32 %v1233_v12, %v1134_v22  ;;  %1557 = vmatprep.mubr.f32.mxu1 %v1334_v3  ;;  %v1432_v22 = vld [vmem:[#allocation5 + $0x2d8] sm:$0xff]  ;;  %v1447_v3 = vld [vmem:[#allocation5 + $0x350] sm:$0xff] }
 0x361   : > { %v1337_v15 = vmax.f32 %v1232_v10, 0.0  ;;  %1558 = vmatmul.mubr.f32.gmra.mrb[28].mxu1 %v1333_v63  ;;  %v2366_v28 = vpack.c.bf16 %v1432_v22, %v1430_v9  ;;  %v2382_v63 = vpack.c.bf16 %v1448_v54, %v1446_v53  ;;  %v1462_v9 = vld [vmem:[#allocation5 + $0x3c8] sm:$0xff]  ;;  %v1464_v22 = vld [vmem:[#allocation5 + $0x3d8] sm:$0xff] }
 0x362   : > { %2353 = vmatpush1.bf16.msra.mxu1 %v2352_v0  ;;  %v1338_v19 = vmax.f32 %v1234_v14, 0.0  ;;  %v1445_v0 = vld [vmem:[#allocation5 + $0x340] sm:$0xff]  ;;  %v1681_v53 = vld [vmem:[%s3082_s5 + $0x70] sm:$0xff]  ;;  %v1682_v54 = vld [vmem:[%s3082_s5 + $0x78] sm:$0xff] }
 0x363   : > { %2355 = vmatprep.subr.bf16.mxu1 %v2354_v5  ;;  %v1450_v5 = vld [vmem:[#allocation5 + $0x368] sm:$0xff]  ;;  %v2384_v7 = vpack.c.bf16 %v1447_v3, %v1445_v0 }
 0x364   : > { %1563 = vmatprep.mubr.f32.mxu1 %v1338_v19  ;;  %v2386_v12 = vpack.c.bf16 %v1452_v6, %v1450_v5  ;;  %v2388_v19 = vpack.c.bf16 %v1451_v13, %v1449_v57 }
 0x365   : > { %1564 = vmatmul.mubr.f32.gmra.mrb[30].mxu1 %v1337_v15  ;;  %v1454_v15 = vld [vmem:[#allocation5 + $0x388] sm:$0xff] }
 0x366   : > { %2357 = vmatpush1.bf16.msra.mxu1 %v2356_v17  ;;  %v1456_v17 = vld [vmem:[#allocation5 + $0x398] sm:$0xff] }
 0x367   : > { %2359 = vmatprep.subr.bf16.mxu1 %v2358_v8  ;;  %v2390_v8 = vpack.c.bf16 %v1456_v17, %v1454_v15 }
 0x36a   : > { %2361 = vmatpush1.bf16.msra.mxu1 %v2360_v23  ;;  %v2392_v23 = vpack.c.bf16 %v1455_v16, %v1453_v20 }
 0x36b   : > { %2363 = vmatprep.subr.bf16.mxu1 %v2362_v25  ;;  %v2394_v25 = vpack.c.bf16 %v1460_v21, %v1458_v58 }
 0x36e   : > { %2365 = vmatpush1.bf16.msra.mxu1 %v2364_v27  ;;  %v2396_v27 = vpack.c.bf16 %v1459_v18, %v1457_v26 }
 0x36f   : > { %2367 = vmatprep.subr.bf16.mxu1 %v2366_v28  ;;  %v2398_v28 = vpack.c.bf16 %v1464_v22, %v1462_v9 }
 0x372   : > { %2369 = vmatpush1.bf16.msra.mxu1 %v2368_v31  ;;  %v3027_v39 = vpop.f32.mrb[16].mxu1  ;;  %v2400_v31 = vpack.c.bf16 %v1463_v29, %v1461_v11 }
 0x373   : > { %2371 = vmatprep.subr.bf16.mxu1 %v2370_v32  ;;  %v1304_v43 = vpop.f32.mrb[17].mxu1  ;;  %v1138_v32 = vrot.slane %v3016_v1, %v394_v62 }
 0x374   : > { %v1305_v46 = vadd.f32 %v1304_v43, %v3025_v37 }
 0x376   : > { %2373 = vmatpush1.bf16.msra.mxu1 %v2372_v38  ;;  %v1328_v48 = vmax.f32 %v1305_v46, 0.0  ;;  %v3030_v49 = vpop.f32.mrb[18].mxu1  ;;  %v2404_v38 = vpack.c.bf16 %v1467_v35, %v1465_v34 }
 0x377   : > { %2375 = vmatprep.subr.bf16.mxu1 %v2374_v40  ;;  %v1310_v52 = vpop.f32.mrb[19].mxu1  ;;  %v1303_v40 = vadd.f32 %v3027_v39, %v1138_v32  ;;  %v1309_v55 = vadd.f32 %v3030_v49, %v1138_v32  ;;  %v1679_v49 = vld [vmem:[%s3082_s5 + $0x60] sm:$0xff] }
 0x378   : > { %1634 = vmatprep.mubr.f32.mxu1 %v1328_v48  ;;  %v1311_v36 = vadd.f32 %v1310_v52, %v3025_v37  ;;  %v2434_v52 = vpack.c.bf16 %v1698_v51, %v1697_v50 }
 0x379   : > { %v1327_v43 = vmax.f32 %v1303_v40, 0.0  ;;  %v1331_v44 = vmax.f32 %v1309_v55, 0.0 }
 0x37a   : > { %2377 = vmatpush1.bf16.msra.mxu1 %v2376_v47  ;;  %v3032_v61 = vpop.f32.mrb[20].mxu1  ;;  %v1332_v41 = vmax.f32 %v1311_v36, 0.0 }
 0x37b   : > { %2379 = vmatprep.subr.bf16.mxu1 %v2378_v4  ;;  %v1316_v2 = vpop.f32.mrb[21].mxu1  ;;  %v1315_v45 = vadd.f32 %v3032_v61, %v1138_v32  ;;  %v1469_v61 = vld [vmem:[%s3081_s4] sm:$0x3] }
 0x37c   : > { %v1317_v42 = vadd.f32 %v1316_v2, %v3025_v37  ;;  %v1478_v0 = vrot.slane %v1469_v61, %v2849_v59 }
 0x37d   : > { %v1335_v39 = vmax.f32 %v1315_v45, 0.0 }
 0x37e   : > { %2381 = vmatpush1.bf16.msra.mxu1 %v2380_v60  ;;  %v1320_v10 = vpop.f32.mrb[22].mxu1  ;;  %v1336_v62 = vmax.f32 %v1317_v42, 0.0  ;;  %v2436_v60 = vpack.c.bf16 %v1682_v54, %v1681_v53 }
 0x37f   : > { %2383 = vmatprep.subr.bf16.mxu1 %v2382_v63  ;;  %v1322_v14 = vpop.f32.mrb[23].mxu1  ;;  %v1321_v47 = vadd.f32 %v1320_v10, %v1138_v32  ;;  %v1474_v63 = vrot.slane %v1469_v61, %v2841_v56 }
 0x380   : > { %v1323_v1 = vadd.f32 %v1322_v14, %v3025_v37  ;;  %v1680_v37 = vld [vmem:[%s3082_s5 + $0x68] sm:$0xff] }
 0x381   : > { %v1339_v48 = vmax.f32 %v1321_v47, 0.0  ;;  %v2432_v4 = vpack.c.bf16 %v1680_v37, %v1679_v49 }
 0x382   : > { %2385 = vmatpush1.bf16.msra.mxu1 %v2384_v7  ;;  %v1340_v46 = vmax.f32 %v1323_v1, 0.0 }
 0x383   : > { %2387 = vmatprep.subr.bf16.mxu1 %v2386_v12  ;;  %2433 = vmatpush3.bf16.msra.mxu0 %v2432_v4 }
 0x384   : > { %2435 = vmatprep.subr.bf16.mxu0 %v2434_v52 }
 0x386   : > { %2389 = vmatpush1.bf16.msra.mxu1 %v2388_v19 }
 0x387   : > { %2391 = vmatprep.subr.bf16.mxu1 %v2390_v8  ;;  %2437 = vmatpush3.bf16.msra.mxu0 %v2436_v60 }
 0x38a   : > { %2393 = vmatpush1.bf16.msra.mxu1 %v2392_v23 }
 0x38b   : > { %2395 = vmatprep.subr.bf16.mxu1 %v2394_v25 }
 0x38e   : > { %2397 = vmatpush1.bf16.msra.mxu1 %v2396_v27  ;;  %v1707_v27 = vpop.permute.xlu0 %1706 }
 0x38f   : > { %2399 = vmatprep.subr.bf16.mxu1 %v2398_v28 }
 0x392   : > { %2401 = vmatpush1.bf16.msra.mxu1 %v2400_v31 }
 0x393   : > { %2403 = vmatprep.subr.bf16.mxu1 %v2402_v33 }
 0x396   : > { %2405 = vmatpush1.bf16.msra.mxu1 %v2404_v38 }
 0x399   : > { %1635 = vmatmul.mubr.f32.vlgmr.msra.gmra.mrb[24].mxu1 %v1327_v43 }
 0x39a   : > { %1640 = vmatprep.mubr.f32.mxu1 %v1332_v41 }
 0x39d   : > { %1641 = vmatmul.mubr.f32.gmra.mrb[26].mxu1 %v1331_v44 }
 0x39e   : > { %1646 = vmatprep.mubr.f32.mxu1 %v1336_v62 }
 0x3a1   : > { %1647 = vmatmul.mubr.f32.gmra.mrb[28].mxu1 %v1335_v39 }
 0x3a2   : > { %1652 = vmatprep.mubr.f32.mxu1 %v1340_v46 }
 0x3a5   : > { %1653 = vmatmul.mubr.f32.gmra.mrb[30].mxu1 %v1339_v48 }
 0x46c   : > { %v1636_v3 = vpop.f32.mrb[24].mxu1 }
 0x46d   : > { %v2446_v2 = vadd.f32 %v1636_v3, %v1474_v63  ;;  %v1638_v5 = vpop.f32.mrb[25].mxu1 }
 0x46e   : > { %v2447_v6 = vadd.f32 %v1638_v5, %v1478_v0 }
 0x46f   : > { %v1659_v12 = vmax.f32 %v2446_v2, 0.0 }
 0x470   : > { %v1660_v7 = vmax.f32 %v2447_v6, 0.0  ;;  %v1642_v10 = vpop.f32.mrb[26].mxu1 }
 0x471   : > { %v2448_v57 = vadd.f32 %v1642_v10, %v1474_v63  ;;  %v1644_v13 = vpop.f32.mrb[27].mxu1 }
 0x472   : > { %v2449_v14 = vadd.f32 %v1644_v13, %v1478_v0  ;;  %1773 = vmatprep.mubr.f32.mxu0 %v1660_v7 }
 0x473   : > { %1774 = vmatmul.mubr.f32.vlgmr.msra.gmra.mrb[24].mxu0 %v1659_v12  ;;  %v1661_v19 = vmax.f32 %v2448_v57, 0.0 }
 0x474   : > { %v1662_v15 = vmax.f32 %v2449_v14, 0.0  ;;  %v1648_v17 = vpop.f32.mrb[28].mxu1 }
 0x475   : > { %v2450_v8 = vadd.f32 %v1648_v17, %v1474_v63  ;;  %v1650_v20 = vpop.f32.mrb[29].mxu1 }
 0x476   : > { %v2451_v56 = vadd.f32 %v1650_v20, %v1478_v0  ;;  %1778 = vmatprep.mubr.f32.mxu0 %v1662_v15 }
 0x477   : > { %1779 = vmatmul.mubr.f32.gmra.mrb[26].mxu0 %v1661_v19  ;;  %v1663_v58 = vmax.f32 %v2450_v8, 0.0 }
 0x478   : > { %v1664_v59 = vmax.f32 %v2451_v56, 0.0  ;;  %v1654_v16 = vpop.f32.mrb[30].mxu1 }
 0x479   : > { %v2452_v21 = vadd.f32 %v1654_v16, %v1474_v63  ;;  %v1656_v23 = vpop.f32.mrb[31].mxu1 }
 0x47a   : > { %v2453_v25 = vadd.f32 %v1656_v23, %v1478_v0  ;;  %1783 = vmatprep.mubr.f32.mxu0 %v1664_v59 }
 0x47b   : > { %1784 = vmatmul.mubr.f32.gmra.mrb[28].mxu0 %v1663_v58  ;;  %v1665_v18 = vmax.f32 %v2452_v21, 0.0 }
 0x47c   : > { %v1666_v26 = vmax.f32 %v2453_v25, 0.0 }
 0x47e   : > { %1788 = vmatprep.mubr.f32.mxu0 %v1666_v26 }
 0x47f   : > { %1789 = vmatmul.mubr.f32.gmra.mrb[30].mxu0 %v1665_v18 }
 0x546   : > { %v1978_v9 = vpop.f32.mrb[24].mxu0 }
 0x547   : > { %v1979_v22 = vpop.f32.mrb[25].mxu0 }
 0x548   : > { %v1980_v28 = vadd.f32 %v1979_v22, %v1978_v9 }
 0x54a   : > { %v1776_v11 = vadd.f32 %v1980_v28, %v1707_v27  ;;  %v1981_v29 = vpop.f32.mrb[26].mxu0 }
 0x54b   : > { %v1982_v24 = vpop.f32.mrb[27].mxu0 }
 0x54c   : > { %1896 = vst.msk [vmem:[%s2991_s11 + $0x20] sm:$0xff] %vm1051_vm0, %v1776_v11  ;;  %v1983_v30 = vadd.f32 %v1982_v24, %v1981_v29 }
 0x54e   : > { %v1781_v31 = vadd.f32 %v1983_v30, %v1707_v27  ;;  %v1984_v32 = vpop.f32.mrb[28].mxu0 }
 0x54f   : > { %v1985_v33 = vpop.f32.mrb[29].mxu0 }
 0x550   : > { %1897 = vst.msk [vmem:[%s2991_s11 + $0x28] sm:$0xff] %vm1051_vm0, %v1781_v31  ;;  %v1986_v34 = vadd.f32 %v1985_v33, %v1984_v32 }
 0x552   : > { %v1786_v35 = vadd.f32 %v1986_v34, %v1707_v27  ;;  %v1987_v36 = vpop.f32.mrb[30].mxu0 }
 0x553   : > { %v1988_v38 = vpop.f32.mrb[31].mxu0 }
 0x554   : > { %1898 = vst.msk [vmem:[%s2991_s11 + $0x30] sm:$0xff] %vm1051_vm0, %v1786_v35  ;;  %v1989_v40 = vadd.f32 %v1988_v38, %v1987_v36 }
 0x556   : > { %v1791_v41 = vadd.f32 %v1989_v40, %v1707_v27 }
 0x558   : > { %1899 = vst.msk [vmem:[%s2991_s11 + $0x38] sm:$0xff] %vm1051_vm0, %v1791_v41 }
 0x559 PF: > { %s21_s26 = sadd.s32 1, %s2576_s26  }
 0x55a   : > { %p18_p2 = scmp.ge.s32.totalorder %s21_s26, 5  }
 0x55c   :  { %20 = sbr.rel (!%p18_p2) target bundleno = 5 (0x5), region = 89 }
 0x563   :  { %1821 = vsyncpa [#allocation4], 1 }
 0x564   :  { %1823 = vsyncpa [#allocation4 + $0x1], 1 }
 0x565   :  { %1824 = vsyncpa [#allocation6], 1 }

</bundles_post_ra>
